<compile_context>
chip_gen: v6e
topology: v6e:2x2x1
jax: 0.10.0
libtpu: 0.0.40
codegen_flags: <defaults>
</compile_context>

<pallas_src>
import jax
import jax.numpy as jnp
from jax import lax
from jax.experimental import pallas as pl
from jax.experimental.pallas import tpu as pltpu


# Keep f32 so numerics match the float32 PyTorch reference; flip to bf16 on
# v6e/v7x only if drift vs the f32 reference is acceptable (low priority: the
# recurrence is latency-bound, not MXU-throughput-bound, at these sizes).
MATMUL_DTYPE = jnp.float32


# ----------------------------------------------------------------------------
# Pallas kernel: bidirectional, stacked 2-layer LSTM, full time loop inside.
# Both directions are folded into the row (batch) dimension.
# ----------------------------------------------------------------------------
def _bidir_two_layer_lstm_kernel(
    xbd_ref,     # (T, R, 2E)  block-diag embeds: fwd rows [x|0], bwd rows [0|x]; R=2*Bp
    wx1bd_ref,   # (2E, 4H)    [wx1_fwd ; wx1_bwd] stacked on the contraction axis
    whbig_ref,   # (2H, 16H)   [[wh1_f, 0, wh1_b, 0], [0, wh2_f, 0, wh2_b]]
    wx2cat_ref,  # (H,  8H)    [wx2_fwd | wx2_bwd]
    b1_ref,      # (R, 4H)     per-row layer-1 bias (fwd rows b1_f, bwd rows b1_b)
    b2_ref,      # (R, 4H)     per-row layer-2 bias
    out_ref,     # (T, R, 2H)  lanes [0:H] = layer-1 h, [H:2H] = layer-2 h
):
    T, R, E2 = xbd_ref.shape
    H4 = b1_ref.shape[-1]
    H = H4 // 4
    Bp = R // 2

    # Hoist (tiny) weights / bias out of the time loop.
    wx1bd = wx1bd_ref[...].astype(MATMUL_DTYPE)
    whbig = whbig_ref[...].astype(MATMUL_DTYPE)
    wx2cat = wx2cat_ref[...].astype(MATMUL_DTYPE)
    b2 = b2_ref[...]

    # ---- hoisted layer-1 input projection for ALL steps & both directions ----
    # One (T*R, 2E) @ (2E, 4H) matmul; block-diag x picks the right per-direction
    # wx1 with exact-zero off blocks, and b1 is folded in once here.
    xg1 = (
        jnp.dot(
            xbd_ref[...].reshape(T * R, E2).astype(MATMUL_DTYPE),
            wx1bd,
            preferred_element_type=jnp.float32,
        ).reshape(T, R, H4)
        + b1_ref[...]
    )

    # Hoisted masks (JAX does not CSE broadcast_in_dim; build once).
    fwd_rows = lax.broadcasted_iota(jnp.int32, (R, 1), 0) < Bp            # (R, 1)
    lane = lax.broadcasted_iota(jnp.int32, (R, H4), 1)
    g_block = (lane >= 2 * H) & (lane < 3 * H)                            # tanh lanes

    def cell_update(gates, c_prev):
        # Full-width activations on the EUP + one select, then the gate slices.
        act = jnp.where(g_block, jnp.tanh(gates), jax.nn.sigmoid(gates))
        i_g = act[:, 0 * H:1 * H]
        f_g = act[:, 1 * H:2 * H]
        g_g = act[:, 2 * H:3 * H]
        o_g = act[:, 3 * H:4 * H]
        c_new = f_g * c_prev + i_g * g_g
        h_new = o_g * jnp.tanh(c_new)
        return h_new, c_new

    h1 = jnp.zeros((R, H), jnp.float32)
    c1 = jnp.zeros((R, H), jnp.float32)
    h2 = jnp.zeros((R, H), jnp.float32)
    c2 = jnp.zeros((R, H), jnp.float32)

    # Fully-unrolled time loop (T is small & static).  Per step only TWO matmuls
    # remain on the serial chain: the fused recurrent matmul and h1_new @ wx2.
    for t in range(T):
        # One fused recurrent matmul for layer-1 AND layer-2, both directions.
        h_cat = jnp.concatenate([h1, h2], axis=-1)                         # (R, 2H)
        rec_wide = jnp.dot(
            h_cat.astype(MATMUL_DTYPE), whbig, preferred_element_type=jnp.float32
        )                                                                  # (R, 16H)
        rec = jnp.where(fwd_rows, rec_wide[:, : 2 * H4], rec_wide[:, 2 * H4:])  # (R, 8H)
        g1_rec = rec[:, :H4]
        g2_rec = rec[:, H4:]

        h1, c1 = cell_update(xg1[t] + g1_rec, c1)

        g2in_wide = jnp.dot(
            h1.astype(MATMUL_DTYPE), wx2cat, preferred_element_type=jnp.float32
        )                                                                  # (R, 8H)
        g2_in = jnp.where(fwd_rows, g2in_wide[:, :H4], g2in_wide[:, H4:])

        h2, c2 = cell_update(g2_in + g2_rec + b2, c2)

        # Single widened (R, 2H) store per step (layer-1 | layer-2 on lanes).
        out_ref[t] = jnp.concatenate([h1, h2], axis=-1)


def bidir_two_layer_lstm(x_bd, wx1_bd, wh_big, wx2_cat, b1_rows, b2_rows):
    """Single pallas_call running both directions & both stacked layers."""
    T, R, _ = x_bd.shape
    H4 = b1_rows.shape[-1]
    H = H4 // 4

    def vmem():
        return pl.BlockSpec(memory_space=pltpu.MemorySpace.VMEM)

    return pl.pallas_call(
        _bidir_two_layer_lstm_kernel,
        out_shape=jax.ShapeDtypeStruct((T, R, 2 * H), jnp.float32),
        in_specs=[vmem() for _ in range(6)],
        out_specs=vmem(),
    )(x_bd, wx1_bd, wh_big, wx2_cat, b1_rows, b2_rows)


def _round_up(x, m):
    return ((x + m - 1) // m) * m


# ----------------------------------------------------------------------------
# ELMo_Embeddings forward (matches the PyTorch module's forward exactly)
# ----------------------------------------------------------------------------
@jax.jit
def elmo_embeddings_forward(input_ids, params):
    emb = params["embedding"]
    (wx1_f, wh1_f, b1_f), (wx2_f, wh2_f, b2_f) = params["lstm_forward"]
    (wx1_b, wh1_b, b1_b), (wx2_b, wh2_b, b2_b) = params["lstm_backward"]

    B, T = input_ids.shape
    H = wh1_f.shape[0]
    H4 = 4 * H

    # Time-major embedding gather; backward embedding reuses the forward gather
    # (same frozen table), so it is just a time flip.
    ids_tm = input_ids.T                                # (T, B)
    fwd_embed_tm = emb[ids_tm]                          # (T, B, E)
    bwd_embed_tm = jnp.flip(fwd_embed_tm, axis=0)       # (T, B, E)

    # Pad the batch so the folded row count 2*Bp fills the 8-row f32 sublane tile.
    Bp = max(_round_up(B, 4), 4)
    pad = Bp - B
    fwd_p = jnp.pad(fwd_embed_tm, ((0, 0), (0, pad), (0, 0)))
    bwd_p = jnp.pad(bwd_embed_tm, ((0, 0), (0, pad), (0, 0)))

    # Block-diagonal input: fwd rows carry [x | 0], bwd rows carry [0 | x].
    z = jnp.zeros_like(fwd_p)
    x_bd = jnp.concatenate(
        [jnp.concatenate([fwd_p, z], axis=-1),
         jnp.concatenate([z, bwd_p], axis=-1)],
        axis=1,
    )                                                    # (T, 2Bp, 2E)

    # Fused weight layouts; off-diagonal blocks are exact zeros (no bias leak).
    wx1_bd = jnp.concatenate([wx1_f, wx1_b], axis=0)     # (2E, 4H)
    zH = jnp.zeros((H, H4), jnp.float32)
    wh_big = jnp.concatenate(
        [jnp.concatenate([wh1_f, zH, wh1_b, zH], axis=1),
         jnp.concatenate([zH, wh2_f, zH, wh2_b], axis=1)],
        axis=0,
    )                                                    # (2H, 16H)
    wx2_cat = jnp.concatenate([wx2_f, wx2_b], axis=1)    # (H, 8H)

    b1_rows = jnp.concatenate(
        [jnp.broadcast_to(b1_f, (Bp, H4)), jnp.broadcast_to(b1_b, (Bp, H4))], axis=0)
    b2_rows = jnp.concatenate(
        [jnp.broadcast_to(b2_f, (Bp, H4)), jnp.broadcast_to(b2_b, (Bp, H4))], axis=0)

    out = bidir_two_layer_lstm(x_bd, wx1_bd, wh_big, wx2_cat, b1_rows, b2_rows)
    # out: (T, 2Bp, 2H); lanes [0:H] = layer-1 h, [H:2H] = layer-2 h.

    fwd1_tm = out[:, :B, :H]
    fwd2_tm = out[:, :B, H:]
    # Module flips the backward outputs back to natural time order.
    bwd1_tm = jnp.flip(out[:, Bp:Bp + B, :H], axis=0)
    bwd2_tm = jnp.flip(out[:, Bp:Bp + B, H:], axis=0)

    fwd_embed_bt = jnp.transpose(fwd_embed_tm, (1, 0, 2))             # (B, T, E)
    # Faithful to the reference module: e1 = cat(forward_embed, forward_embed).
    e1 = jnp.concatenate([fwd_embed_bt, fwd_embed_bt], axis=-1)       # (B, T, 2E)
    e2 = jnp.transpose(jnp.concatenate([fwd1_tm, bwd1_tm], axis=-1), (1, 0, 2))
    e3 = jnp.transpose(jnp.concatenate([fwd2_tm, bwd2_tm], axis=-1), (1, 0, 2))
    return e1, e2, e3


# ----------------------------------------------------------------------------
# Pure-JAX reference (for correctness check; mirrors torch.nn.LSTM math)
# ----------------------------------------------------------------------------
def _lstm_ref(x_tm, wx, wh, b):
    H = wh.shape[0]

    def step(carry, x_t):
        h, c = carry
        gates = x_t @ wx + h @ wh + b
        i = jax.nn.sigmoid(gates[:, :H])
        f = jax.nn.sigmoid(gates[:, H:2 * H])
        g = jnp.tanh(gates[:, 2 * H:3 * H])
        o = jax.nn.sigmoid(gates[:, 3 * H:])
        c = f * c + i * g
        h = o * jnp.tanh(c)
        return (h, c), h

    B = x_tm.shape[1]
    init = (jnp.zeros((B, H), jnp.float32), jnp.zeros((B, H), jnp.float32))
    _, hs = lax.scan(step, init, x_tm)
    return hs                                            # (T, B, H)


def elmo_embeddings_reference(input_ids, params):
    emb = params["embedding"]
    (wx1_f, wh1_f, b1_f), (wx2_f, wh2_f, b2_f) = params["lstm_forward"]
    (wx1_b, wh1_b, b1_b), (wx2_b, wh2_b, b2_b) = params["lstm_backward"]

    ids_tm = input_ids.T
    fwd_embed_tm = emb[ids_tm]
    bwd_embed_tm = jnp.flip(fwd_embed_tm, axis=0)

    f1 = _lstm_ref(fwd_embed_tm, wx1_f, wh1_f, b1_f)
    f2 = _lstm_ref(f1, wx2_f, wh2_f, b2_f)
    b1 = _lstm_ref(bwd_embed_tm, wx1_b, wh1_b, b1_b)
    b2 = _lstm_ref(b1, wx2_b, wh2_b, b2_b)
    b1 = jnp.flip(b1, axis=0)
    b2 = jnp.flip(b2, axis=0)

    fwd_embed_bt = jnp.transpose(fwd_embed_tm, (1, 0, 2))
    e1 = jnp.concatenate([fwd_embed_bt, fwd_embed_bt], axis=-1)
    e2 = jnp.transpose(jnp.concatenate([f1, b1], axis=-1), (1, 0, 2))
    e3 = jnp.transpose(jnp.concatenate([f2, b2], axis=-1), (1, 0, 2))
    return e1, e2, e3


# ----------------------------------------------------------------------------
# Deterministic parameter construction (synthetic; no checkpoint load)
# ----------------------------------------------------------------------------
def make_params(key, vocab_size, embedding_dim, hidden_dim):
    H = hidden_dim

    def lstm_params(k, in_dim):
        k1, k2, k3 = jax.random.split(k, 3)
        scale = 1.0 / jnp.sqrt(H)
        # Fused gate layout [i | f | g | o] (torch.nn.LSTM order).
        # wx corresponds to weight_ih.T, wh to weight_hh.T; b = b_ih + b_hh.
        wx = jax.random.uniform(k1, (in_dim, 4 * H), jnp.float32, -scale, scale)
        wh = jax.random.uniform(k2, (H, 4 * H), jnp.float32, -scale, scale)
        b = jax.random.uniform(k3, (1, 4 * H), jnp.float32, -scale, scale)
        return wx, wh, b

    ke, kf1, kf2, kb1, kb2 = jax.random.split(key, 5)
    # Both torch embeddings are from_pretrained(embedding_matrix) (same frozen
    # table), so a single table is used here.
    embedding = jax.random.normal(ke, (vocab_size, embedding_dim), jnp.float32) * 0.1
    return {
        "embedding": embedding,
        "lstm_forward": (lstm_params(kf1, embedding_dim), lstm_params(kf2, H)),
        "lstm_backward": (lstm_params(kb1, embedding_dim), lstm_params(kb2, H)),
    }
    # TODO(synk): linear_mode1 / linear_mode2 exist in the module's __init__ but
    # are unused in forward(), so they are intentionally not instantiated.


if __name__ == "__main__":
    key = jax.random.PRNGKey(0)

    # Small shapes consistent with the module (embedding_dim == hidden_dim).
    batch, seq_len = 2, 8
    vocab_size, embedding_dim, hidden_dim = 50, 32, 32

    kp, kx = jax.random.split(key)
    params = make_params(kp, vocab_size, embedding_dim, hidden_dim)
    input_ids = jax.random.randint(kx, (batch, seq_len), 0, vocab_size, jnp.int32)

    e1, e2, e3 = elmo_embeddings_forward(input_ids, params)
    jax.block_until_ready((e1, e2, e3))

    assert e1.shape == (batch, seq_len, 2 * embedding_dim)
    assert e2.shape == (batch, seq_len, 2 * hidden_dim)
    assert e3.shape == (batch, seq_len, 2 * hidden_dim)
    assert bool(jnp.all(jnp.isfinite(e1)) & jnp.all(jnp.isfinite(e2)) & jnp.all(jnp.isfinite(e3)))

    # Validate against the pure-JAX reference (f32, should match tightly).
    r1, r2, r3 = elmo_embeddings_reference(input_ids, params)
    assert bool(jnp.allclose(e1, r1, atol=1e-4, rtol=1e-4))
    assert bool(jnp.allclose(e2, r2, atol=1e-4, rtol=1e-4))
    assert bool(jnp.allclose(e3, r3, atol=1e-4, rtol=1e-4))

    print("KERNEL_OK")
</pallas_src>

<mosaic_0001>
module attributes {stable_mosaic.version = 11 : i64} {
  func.func @_bidir_two_layer_lstm_kernel(%arg0: memref<8x8x64xf32, #tpu.memory_space<vmem>>, %arg1: memref<64x128xf32, #tpu.memory_space<vmem>>, %arg2: memref<64x512xf32, #tpu.memory_space<vmem>>, %arg3: memref<32x256xf32, #tpu.memory_space<vmem>>, %arg4: memref<8x128xf32, #tpu.memory_space<vmem>>, %arg5: memref<8x128xf32, #tpu.memory_space<vmem>>, %arg6: memref<8x8x64xf32, #tpu.memory_space<vmem>>) attributes {dimension_semantics = [], scalar_prefetch = 0 : i64, scratch_operands = 0 : i64, tpu.core_type = #tpu.core_type<tc>} {
    %c0 = arith.constant 0 : index
    %c0_0 = arith.constant 0 : index
    %0 = vector.load %arg1[%c0, %c0_0] : memref<64x128xf32, #tpu.memory_space<vmem>>, vector<64x128xf32>
    %c0_1 = arith.constant 0 : index
    %c0_2 = arith.constant 0 : index
    %1 = vector.load %arg2[%c0_1, %c0_2] : memref<64x512xf32, #tpu.memory_space<vmem>>, vector<64x512xf32>
    %c0_3 = arith.constant 0 : index
    %c0_4 = arith.constant 0 : index
    %2 = vector.load %arg3[%c0_3, %c0_4] : memref<32x256xf32, #tpu.memory_space<vmem>>, vector<32x256xf32>
    %c0_5 = arith.constant 0 : index
    %c0_6 = arith.constant 0 : index
    %3 = vector.load %arg5[%c0_5, %c0_6] : memref<8x128xf32, #tpu.memory_space<vmem>>, vector<8x128xf32>
    %c0_7 = arith.constant 0 : index
    %c0_8 = arith.constant 0 : index
    %c0_9 = arith.constant 0 : index
    %4 = vector.load %arg0[%c0_7, %c0_8, %c0_9] : memref<8x8x64xf32, #tpu.memory_space<vmem>>, vector<8x8x64xf32>
    %5 = vector.shape_cast %4 : vector<8x8x64xf32> to vector<64x64xf32>
    %cst = arith.constant dense<0.000000e+00> : vector<64x128xf32>
    %6 = tpu.matmul %5, %0, %cst {dimension_numbers = #tpu.dot_dimension_numbers<[1], [0], [0], [1], [0, 0, 1, 1], [], []>} : vector<64x64xf32>, vector<64x128xf32>, vector<64x128xf32> -> vector<64x128xf32>
    %7 = vector.shape_cast %6 : vector<64x128xf32> to vector<8x8x128xf32>
    %c0_10 = arith.constant 0 : index
    %c0_11 = arith.constant 0 : index
    %8 = vector.load %arg4[%c0_10, %c0_11] : memref<8x128xf32, #tpu.memory_space<vmem>>, vector<8x128xf32>
    %9 = vector.shape_cast %8 : vector<8x128xf32> to vector<1x8x128xf32>
    %10 = vector.broadcast %9 : vector<1x8x128xf32> to vector<8x8x128xf32>
    %11 = arith.addf %7, %10 : vector<8x8x128xf32>
    %12 = tpu.iota {dimensions = array<i32: 0>} : vector<8x1xi32>
    %c4_i32 = arith.constant 4 : i32
    %13 = vector.broadcast %c4_i32 : i32 to vector<8x1xi32>
    %14 = arith.cmpi slt, %12, %13 : vector<8x1xi32>
    %15 = tpu.iota {dimensions = array<i32: 1>} : vector<8x128xi32>
    %c64_i32 = arith.constant 64 : i32
    %16 = vector.broadcast %c64_i32 : i32 to vector<8x128xi32>
    %17 = arith.cmpi sge, %15, %16 : vector<8x128xi32>
    %c96_i32 = arith.constant 96 : i32
    %18 = vector.broadcast %c96_i32 : i32 to vector<8x128xi32>
    %19 = arith.cmpi slt, %15, %18 : vector<8x128xi32>
    %20 = arith.andi %17, %19 : vector<8x128xi1>
    %cst_12 = arith.constant 0.000000e+00 : f32
    %21 = vector.broadcast %cst_12 : f32 to vector<8x32xf32>
    %cst_13 = arith.constant 0.000000e+00 : f32
    %22 = vector.broadcast %cst_13 : f32 to vector<8x32xf32>
    %cst_14 = arith.constant 0.000000e+00 : f32
    %23 = vector.broadcast %cst_14 : f32 to vector<8x32xf32>
    %cst_15 = arith.constant 0.000000e+00 : f32
    %24 = vector.broadcast %cst_15 : f32 to vector<8x32xf32>
    %25 = tpu.concatenate %21, %23 in 1 : vector<8x32xf32>, vector<8x32xf32> -> vector<8x64xf32>
    %cst_16 = arith.constant dense<0.000000e+00> : vector<8x512xf32>
    %26 = tpu.matmul %25, %1, %cst_16 {dimension_numbers = #tpu.dot_dimension_numbers<[1], [0], [0], [1], [0, 0, 1, 1], [], []>} : vector<8x64xf32>, vector<64x512xf32>, vector<8x512xf32> -> vector<8x512xf32>
    %27 = vector.extract_strided_slice %26 {offsets = [0, 0], sizes = [8, 256], strides = [1, 1]} : vector<8x512xf32> to vector<8x256xf32>
    %28 = vector.extract_strided_slice %26 {offsets = [0, 256], sizes = [8, 256], strides = [1, 1]} : vector<8x512xf32> to vector<8x256xf32>
    %29 = vector.shape_cast %14 : vector<8x1xi1> to vector<8x1xi1>
    %30 = vector.broadcast %29 : vector<8x1xi1> to vector<8x256xi1>
    %31 = arith.select %30, %27, %28 : vector<8x256xi1>, vector<8x256xf32>
    %32 = vector.extract_strided_slice %31 {offsets = [0, 0], sizes = [8, 128], strides = [1, 1]} : vector<8x256xf32> to vector<8x128xf32>
    %33 = vector.extract_strided_slice %31 {offsets = [0, 128], sizes = [8, 128], strides = [1, 1]} : vector<8x256xf32> to vector<8x128xf32>
    %34 = vector.extract_strided_slice %11 {offsets = [0, 0, 0], sizes = [1, 8, 128], strides = [1, 1, 1]} : vector<8x8x128xf32> to vector<1x8x128xf32>
    %35 = vector.shape_cast %34 : vector<1x8x128xf32> to vector<8x128xf32>
    %36 = arith.addf %35, %32 : vector<8x128xf32>
    %37 = math.tanh %36 : vector<8x128xf32>
    %38 = arith.negf %36 : vector<8x128xf32>
    %39 = math.exp %38 : vector<8x128xf32>
    %cst_17 = arith.constant 1.000000e+00 : f32
    %40 = vector.broadcast %cst_17 : f32 to vector<8x128xf32>
    %41 = arith.addf %40, %39 : vector<8x128xf32>
    %42 = arith.divf %40, %41 : vector<8x128xf32>
    %43 = arith.select %20, %37, %42 : vector<8x128xi1>, vector<8x128xf32>
    %44 = vector.extract_strided_slice %43 {offsets = [0, 0], sizes = [8, 32], strides = [1, 1]} : vector<8x128xf32> to vector<8x32xf32>
    %45 = vector.extract_strided_slice %43 {offsets = [0, 32], sizes = [8, 32], strides = [1, 1]} : vector<8x128xf32> to vector<8x32xf32>
    %46 = vector.extract_strided_slice %43 {offsets = [0, 64], sizes = [8, 32], strides = [1, 1]} : vector<8x128xf32> to vector<8x32xf32>
    %47 = vector.extract_strided_slice %43 {offsets = [0, 96], sizes = [8, 32], strides = [1, 1]} : vector<8x128xf32> to vector<8x32xf32>
    %48 = arith.mulf %45, %22 : vector<8x32xf32>
    %49 = arith.mulf %44, %46 : vector<8x32xf32>
    %50 = arith.addf %48, %49 : vector<8x32xf32>
    %51 = math.tanh %50 : vector<8x32xf32>
    %52 = arith.mulf %47, %51 : vector<8x32xf32>
    %cst_18 = arith.constant dense<0.000000e+00> : vector<8x256xf32>
    %53 = tpu.matmul %52, %2, %cst_18 {dimension_numbers = #tpu.dot_dimension_numbers<[1], [0], [0], [1], [0, 0, 1, 1], [], []>} : vector<8x32xf32>, vector<32x256xf32>, vector<8x256xf32> -> vector<8x256xf32>
    %54 = vector.extract_strided_slice %53 {offsets = [0, 0], sizes = [8, 128], strides = [1, 1]} : vector<8x256xf32> to vector<8x128xf32>
    %55 = vector.extract_strided_slice %53 {offsets = [0, 128], sizes = [8, 128], strides = [1, 1]} : vector<8x256xf32> to vector<8x128xf32>
    %56 = vector.shape_cast %14 : vector<8x1xi1> to vector<8x1xi1>
    %57 = vector.broadcast %56 : vector<8x1xi1> to vector<8x128xi1>
    %58 = arith.select %57, %54, %55 : vector<8x128xi1>, vector<8x128xf32>
    %59 = arith.addf %58, %33 : vector<8x128xf32>
    %60 = arith.addf %59, %3 : vector<8x128xf32>
    %61 = math.tanh %60 : vector<8x128xf32>
    %62 = arith.negf %60 : vector<8x128xf32>
    %63 = math.exp %62 : vector<8x128xf32>
    %cst_19 = arith.constant 1.000000e+00 : f32
    %64 = vector.broadcast %cst_19 : f32 to vector<8x128xf32>
    %65 = arith.addf %64, %63 : vector<8x128xf32>
    %66 = arith.divf %64, %65 : vector<8x128xf32>
    %67 = arith.select %20, %61, %66 : vector<8x128xi1>, vector<8x128xf32>
    %68 = vector.extract_strided_slice %67 {offsets = [0, 0], sizes = [8, 32], strides = [1, 1]} : vector<8x128xf32> to vector<8x32xf32>
    %69 = vector.extract_strided_slice %67 {offsets = [0, 32], sizes = [8, 32], strides = [1, 1]} : vector<8x128xf32> to vector<8x32xf32>
    %70 = vector.extract_strided_slice %67 {offsets = [0, 64], sizes = [8, 32], strides = [1, 1]} : vector<8x128xf32> to vector<8x32xf32>
    %71 = vector.extract_strided_slice %67 {offsets = [0, 96], sizes = [8, 32], strides = [1, 1]} : vector<8x128xf32> to vector<8x32xf32>
    %72 = arith.mulf %69, %24 : vector<8x32xf32>
    %73 = arith.mulf %68, %70 : vector<8x32xf32>
    %74 = arith.addf %72, %73 : vector<8x32xf32>
    %75 = math.tanh %74 : vector<8x32xf32>
    %76 = arith.mulf %71, %75 : vector<8x32xf32>
    %77 = tpu.concatenate %52, %76 in 1 : vector<8x32xf32>, vector<8x32xf32> -> vector<8x64xf32>
    %c0_20 = arith.constant 0 : index
    %c0_21 = arith.constant 0 : index
    %c0_22 = arith.constant 0 : index
    %78 = vector.load %arg6[%c0_20, %c0_21, %c0_22] : memref<8x8x64xf32, #tpu.memory_space<vmem>>, vector<1x8x64xf32>
    %79 = vector.shape_cast %78 : vector<1x8x64xf32> to vector<8x64xf32>
    %80 = vector.shape_cast %77 : vector<8x64xf32> to vector<1x8x64xf32>
    tpu.vector_store %arg6[%c0_20, %c0_21, %c0_22], %80 {strides = array<i32>} : memref<8x8x64xf32, #tpu.memory_space<vmem>>, vector<1x8x64xf32>,
    %81 = tpu.concatenate %52, %76 in 1 : vector<8x32xf32>, vector<8x32xf32> -> vector<8x64xf32>
    %cst_23 = arith.constant dense<0.000000e+00> : vector<8x512xf32>
    %82 = tpu.matmul %81, %1, %cst_23 {dimension_numbers = #tpu.dot_dimension_numbers<[1], [0], [0], [1], [0, 0, 1, 1], [], []>} : vector<8x64xf32>, vector<64x512xf32>, vector<8x512xf32> -> vector<8x512xf32>
    %83 = vector.extract_strided_slice %82 {offsets = [0, 0], sizes = [8, 256], strides = [1, 1]} : vector<8x512xf32> to vector<8x256xf32>
    %84 = vector.extract_strided_slice %82 {offsets = [0, 256], sizes = [8, 256], strides = [1, 1]} : vector<8x512xf32> to vector<8x256xf32>
    %85 = vector.shape_cast %14 : vector<8x1xi1> to vector<8x1xi1>
    %86 = vector.broadcast %85 : vector<8x1xi1> to vector<8x256xi1>
    %87 = arith.select %86, %83, %84 : vector<8x256xi1>, vector<8x256xf32>
    %88 = vector.extract_strided_slice %87 {offsets = [0, 0], sizes = [8, 128], strides = [1, 1]} : vector<8x256xf32> to vector<8x128xf32>
    %89 = vector.extract_strided_slice %87 {offsets = [0, 128], sizes = [8, 128], strides = [1, 1]} : vector<8x256xf32> to vector<8x128xf32>
    %90 = vector.extract_strided_slice %11 {offsets = [1, 0, 0], sizes = [1, 8, 128], strides = [1, 1, 1]} : vector<8x8x128xf32> to vector<1x8x128xf32>
    %91 = vector.shape_cast %90 : vector<1x8x128xf32> to vector<8x128xf32>
    %92 = arith.addf %91, %88 : vector<8x128xf32>
    %93 = math.tanh %92 : vector<8x128xf32>
    %94 = arith.negf %92 : vector<8x128xf32>
    %95 = math.exp %94 : vector<8x128xf32>
    %cst_24 = arith.constant 1.000000e+00 : f32
    %96 = vector.broadcast %cst_24 : f32 to vector<8x128xf32>
    %97 = arith.addf %96, %95 : vector<8x128xf32>
    %98 = arith.divf %96, %97 : vector<8x128xf32>
    %99 = arith.select %20, %93, %98 : vector<8x128xi1>, vector<8x128xf32>
    %100 = vector.extract_strided_slice %99 {offsets = [0, 0], sizes = [8, 32], strides = [1, 1]} : vector<8x128xf32> to vector<8x32xf32>
    %101 = vector.extract_strided_slice %99 {offsets = [0, 32], sizes = [8, 32], strides = [1, 1]} : vector<8x128xf32> to vector<8x32xf32>
    %102 = vector.extract_strided_slice %99 {offsets = [0, 64], sizes = [8, 32], strides = [1, 1]} : vector<8x128xf32> to vector<8x32xf32>
    %103 = vector.extract_strided_slice %99 {offsets = [0, 96], sizes = [8, 32], strides = [1, 1]} : vector<8x128xf32> to vector<8x32xf32>
    %104 = arith.mulf %101, %50 : vector<8x32xf32>
    %105 = arith.mulf %100, %102 : vector<8x32xf32>
    %106 = arith.addf %104, %105 : vector<8x32xf32>
    %107 = math.tanh %106 : vector<8x32xf32>
    %108 = arith.mulf %103, %107 : vector<8x32xf32>
    %cst_25 = arith.constant dense<0.000000e+00> : vector<8x256xf32>
    %109 = tpu.matmul %108, %2, %cst_25 {dimension_numbers = #tpu.dot_dimension_numbers<[1], [0], [0], [1], [0, 0, 1, 1], [], []>} : vector<8x32xf32>, vector<32x256xf32>, vector<8x256xf32> -> vector<8x256xf32>
    %110 = vector.extract_strided_slice %109 {offsets = [0, 0], sizes = [8, 128], strides = [1, 1]} : vector<8x256xf32> to vector<8x128xf32>
    %111 = vector.extract_strided_slice %109 {offsets = [0, 128], sizes = [8, 128], strides = [1, 1]} : vector<8x256xf32> to vector<8x128xf32>
    %112 = vector.shape_cast %14 : vector<8x1xi1> to vector<8x1xi1>
    %113 = vector.broadcast %112 : vector<8x1xi1> to vector<8x128xi1>
    %114 = arith.select %113, %110, %111 : vector<8x128xi1>, vector<8x128xf32>
    %115 = arith.addf %114, %89 : vector<8x128xf32>
    %116 = arith.addf %115, %3 : vector<8x128xf32>
    %117 = math.tanh %116 : vector<8x128xf32>
    %118 = arith.negf %116 : vector<8x128xf32>
    %119 = math.exp %118 : vector<8x128xf32>
    %cst_26 = arith.constant 1.000000e+00 : f32
    %120 = vector.broadcast %cst_26 : f32 to vector<8x128xf32>
    %121 = arith.addf %120, %119 : vector<8x128xf32>
    %122 = arith.divf %120, %121 : vector<8x128xf32>
    %123 = arith.select %20, %117, %122 : vector<8x128xi1>, vector<8x128xf32>
    %124 = vector.extract_strided_slice %123 {offsets = [0, 0], sizes = [8, 32], strides = [1, 1]} : vector<8x128xf32> to vector<8x32xf32>
    %125 = vector.extract_strided_slice %123 {offsets = [0, 32], sizes = [8, 32], strides = [1, 1]} : vector<8x128xf32> to vector<8x32xf32>
    %126 = vector.extract_strided_slice %123 {offsets = [0, 64], sizes = [8, 32], strides = [1, 1]} : vector<8x128xf32> to vector<8x32xf32>
    %127 = vector.extract_strided_slice %123 {offsets = [0, 96], sizes = [8, 32], strides = [1, 1]} : vector<8x128xf32> to vector<8x32xf32>
    %128 = arith.mulf %125, %74 : vector<8x32xf32>
    %129 = arith.mulf %124, %126 : vector<8x32xf32>
    %130 = arith.addf %128, %129 : vector<8x32xf32>
    %131 = math.tanh %130 : vector<8x32xf32>
    %132 = arith.mulf %127, %131 : vector<8x32xf32>
    %133 = tpu.concatenate %108, %132 in 1 : vector<8x32xf32>, vector<8x32xf32> -> vector<8x64xf32>
    %c1 = arith.constant 1 : index
    %c0_27 = arith.constant 0 : index
    %c0_28 = arith.constant 0 : index
    %134 = vector.load %arg6[%c1, %c0_27, %c0_28] : memref<8x8x64xf32, #tpu.memory_space<vmem>>, vector<1x8x64xf32>
    %135 = vector.shape_cast %134 : vector<1x8x64xf32> to vector<8x64xf32>
    %136 = vector.shape_cast %133 : vector<8x64xf32> to vector<1x8x64xf32>
    tpu.vector_store %arg6[%c1, %c0_27, %c0_28], %136 {strides = array<i32>} : memref<8x8x64xf32, #tpu.memory_space<vmem>>, vector<1x8x64xf32>,
    %137 = tpu.concatenate %108, %132 in 1 : vector<8x32xf32>, vector<8x32xf32> -> vector<8x64xf32>
    %cst_29 = arith.constant dense<0.000000e+00> : vector<8x512xf32>
    %138 = tpu.matmul %137, %1, %cst_29 {dimension_numbers = #tpu.dot_dimension_numbers<[1], [0], [0], [1], [0, 0, 1, 1], [], []>} : vector<8x64xf32>, vector<64x512xf32>, vector<8x512xf32> -> vector<8x512xf32>
    %139 = vector.extract_strided_slice %138 {offsets = [0, 0], sizes = [8, 256], strides = [1, 1]} : vector<8x512xf32> to vector<8x256xf32>
    %140 = vector.extract_strided_slice %138 {offsets = [0, 256], sizes = [8, 256], strides = [1, 1]} : vector<8x512xf32> to vector<8x256xf32>
    %141 = vector.shape_cast %14 : vector<8x1xi1> to vector<8x1xi1>
    %142 = vector.broadcast %141 : vector<8x1xi1> to vector<8x256xi1>
    %143 = arith.select %142, %139, %140 : vector<8x256xi1>, vector<8x256xf32>
    %144 = vector.extract_strided_slice %143 {offsets = [0, 0], sizes = [8, 128], strides = [1, 1]} : vector<8x256xf32> to vector<8x128xf32>
    %145 = vector.extract_strided_slice %143 {offsets = [0, 128], sizes = [8, 128], strides = [1, 1]} : vector<8x256xf32> to vector<8x128xf32>
    %146 = vector.extract_strided_slice %11 {offsets = [2, 0, 0], sizes = [1, 8, 128], strides = [1, 1, 1]} : vector<8x8x128xf32> to vector<1x8x128xf32>
    %147 = vector.shape_cast %146 : vector<1x8x128xf32> to vector<8x128xf32>
    %148 = arith.addf %147, %144 : vector<8x128xf32>
    %149 = math.tanh %148 : vector<8x128xf32>
    %150 = arith.negf %148 : vector<8x128xf32>
    %151 = math.exp %150 : vector<8x128xf32>
    %cst_30 = arith.constant 1.000000e+00 : f32
    %152 = vector.broadcast %cst_30 : f32 to vector<8x128xf32>
    %153 = arith.addf %152, %151 : vector<8x128xf32>
    %154 = arith.divf %152, %153 : vector<8x128xf32>
    %155 = arith.select %20, %149, %154 : vector<8x128xi1>, vector<8x128xf32>
    %156 = vector.extract_strided_slice %155 {offsets = [0, 0], sizes = [8, 32], strides = [1, 1]} : vector<8x128xf32> to vector<8x32xf32>
    %157 = vector.extract_strided_slice %155 {offsets = [0, 32], sizes = [8, 32], strides = [1, 1]} : vector<8x128xf32> to vector<8x32xf32>
    %158 = vector.extract_strided_slice %155 {offsets = [0, 64], sizes = [8, 32], strides = [1, 1]} : vector<8x128xf32> to vector<8x32xf32>
    %159 = vector.extract_strided_slice %155 {offsets = [0, 96], sizes = [8, 32], strides = [1, 1]} : vector<8x128xf32> to vector<8x32xf32>
    %160 = arith.mulf %157, %106 : vector<8x32xf32>
    %161 = arith.mulf %156, %158 : vector<8x32xf32>
    %162 = arith.addf %160, %161 : vector<8x32xf32>
    %163 = math.tanh %162 : vector<8x32xf32>
    %164 = arith.mulf %159, %163 : vector<8x32xf32>
    %cst_31 = arith.constant dense<0.000000e+00> : vector<8x256xf32>
    %165 = tpu.matmul %164, %2, %cst_31 {dimension_numbers = #tpu.dot_dimension_numbers<[1], [0], [0], [1], [0, 0, 1, 1], [], []>} : vector<8x32xf32>, vector<32x256xf32>, vector<8x256xf32> -> vector<8x256xf32>
    %166 = vector.extract_strided_slice %165 {offsets = [0, 0], sizes = [8, 128], strides = [1, 1]} : vector<8x256xf32> to vector<8x128xf32>
    %167 = vector.extract_strided_slice %165 {offsets = [0, 128], sizes = [8, 128], strides = [1, 1]} : vector<8x256xf32> to vector<8x128xf32>
    %168 = vector.shape_cast %14 : vector<8x1xi1> to vector<8x1xi1>
    %169 = vector.broadcast %168 : vector<8x1xi1> to vector<8x128xi1>
    %170 = arith.select %169, %166, %167 : vector<8x128xi1>, vector<8x128xf32>
    %171 = arith.addf %170, %145 : vector<8x128xf32>
    %172 = arith.addf %171, %3 : vector<8x128xf32>
    %173 = math.tanh %172 : vector<8x128xf32>
    %174 = arith.negf %172 : vector<8x128xf32>
    %175 = math.exp %174 : vector<8x128xf32>
    %cst_32 = arith.constant 1.000000e+00 : f32
    %176 = vector.broadcast %cst_32 : f32 to vector<8x128xf32>
    %177 = arith.addf %176, %175 : vector<8x128xf32>
    %178 = arith.divf %176, %177 : vector<8x128xf32>
    %179 = arith.select %20, %173, %178 : vector<8x128xi1>, vector<8x128xf32>
    %180 = vector.extract_strided_slice %179 {offsets = [0, 0], sizes = [8, 32], strides = [1, 1]} : vector<8x128xf32> to vector<8x32xf32>
    %181 = vector.extract_strided_slice %179 {offsets = [0, 32], sizes = [8, 32], strides = [1, 1]} : vector<8x128xf32> to vector<8x32xf32>
    %182 = vector.extract_strided_slice %179 {offsets = [0, 64], sizes = [8, 32], strides = [1, 1]} : vector<8x128xf32> to vector<8x32xf32>
    %183 = vector.extract_strided_slice %179 {offsets = [0, 96], sizes = [8, 32], strides = [1, 1]} : vector<8x128xf32> to vector<8x32xf32>
    %184 = arith.mulf %181, %130 : vector<8x32xf32>
    %185 = arith.mulf %180, %182 : vector<8x32xf32>
    %186 = arith.addf %184, %185 : vector<8x32xf32>
    %187 = math.tanh %186 : vector<8x32xf32>
    %188 = arith.mulf %183, %187 : vector<8x32xf32>
    %189 = tpu.concatenate %164, %188 in 1 : vector<8x32xf32>, vector<8x32xf32> -> vector<8x64xf32>
    %c2 = arith.constant 2 : index
    %c0_33 = arith.constant 0 : index
    %c0_34 = arith.constant 0 : index
    %190 = vector.load %arg6[%c2, %c0_33, %c0_34] : memref<8x8x64xf32, #tpu.memory_space<vmem>>, vector<1x8x64xf32>
    %191 = vector.shape_cast %190 : vector<1x8x64xf32> to vector<8x64xf32>
    %192 = vector.shape_cast %189 : vector<8x64xf32> to vector<1x8x64xf32>
    tpu.vector_store %arg6[%c2, %c0_33, %c0_34], %192 {strides = array<i32>} : memref<8x8x64xf32, #tpu.memory_space<vmem>>, vector<1x8x64xf32>,
    %193 = tpu.concatenate %164, %188 in 1 : vector<8x32xf32>, vector<8x32xf32> -> vector<8x64xf32>
    %cst_35 = arith.constant dense<0.000000e+00> : vector<8x512xf32>
    %194 = tpu.matmul %193, %1, %cst_35 {dimension_numbers = #tpu.dot_dimension_numbers<[1], [0], [0], [1], [0, 0, 1, 1], [], []>} : vector<8x64xf32>, vector<64x512xf32>, vector<8x512xf32> -> vector<8x512xf32>
    %195 = vector.extract_strided_slice %194 {offsets = [0, 0], sizes = [8, 256], strides = [1, 1]} : vector<8x512xf32> to vector<8x256xf32>
    %196 = vector.extract_strided_slice %194 {offsets = [0, 256], sizes = [8, 256], strides = [1, 1]} : vector<8x512xf32> to vector<8x256xf32>
    %197 = vector.shape_cast %14 : vector<8x1xi1> to vector<8x1xi1>
    %198 = vector.broadcast %197 : vector<8x1xi1> to vector<8x256xi1>
    %199 = arith.select %198, %195, %196 : vector<8x256xi1>, vector<8x256xf32>
    %200 = vector.extract_strided_slice %199 {offsets = [0, 0], sizes = [8, 128], strides = [1, 1]} : vector<8x256xf32> to vector<8x128xf32>
    %201 = vector.extract_strided_slice %199 {offsets = [0, 128], sizes = [8, 128], strides = [1, 1]} : vector<8x256xf32> to vector<8x128xf32>
    %202 = vector.extract_strided_slice %11 {offsets = [3, 0, 0], sizes = [1, 8, 128], strides = [1, 1, 1]} : vector<8x8x128xf32> to vector<1x8x128xf32>
    %203 = vector.shape_cast %202 : vector<1x8x128xf32> to vector<8x128xf32>
    %204 = arith.addf %203, %200 : vector<8x128xf32>
    %205 = math.tanh %204 : vector<8x128xf32>
    %206 = arith.negf %204 : vector<8x128xf32>
    %207 = math.exp %206 : vector<8x128xf32>
    %cst_36 = arith.constant 1.000000e+00 : f32
    %208 = vector.broadcast %cst_36 : f32 to vector<8x128xf32>
    %209 = arith.addf %208, %207 : vector<8x128xf32>
    %210 = arith.divf %208, %209 : vector<8x128xf32>
    %211 = arith.select %20, %205, %210 : vector<8x128xi1>, vector<8x128xf32>
    %212 = vector.extract_strided_slice %211 {offsets = [0, 0], sizes = [8, 32], strides = [1, 1]} : vector<8x128xf32> to vector<8x32xf32>
    %213 = vector.extract_strided_slice %211 {offsets = [0, 32], sizes = [8, 32], strides = [1, 1]} : vector<8x128xf32> to vector<8x32xf32>
    %214 = vector.extract_strided_slice %211 {offsets = [0, 64], sizes = [8, 32], strides = [1, 1]} : vector<8x128xf32> to vector<8x32xf32>
    %215 = vector.extract_strided_slice %211 {offsets = [0, 96], sizes = [8, 32], strides = [1, 1]} : vector<8x128xf32> to vector<8x32xf32>
    %216 = arith.mulf %213, %162 : vector<8x32xf32>
    %217 = arith.mulf %212, %214 : vector<8x32xf32>
    %218 = arith.addf %216, %217 : vector<8x32xf32>
    %219 = math.tanh %218 : vector<8x32xf32>
    %220 = arith.mulf %215, %219 : vector<8x32xf32>
    %cst_37 = arith.constant dense<0.000000e+00> : vector<8x256xf32>
    %221 = tpu.matmul %220, %2, %cst_37 {dimension_numbers = #tpu.dot_dimension_numbers<[1], [0], [0], [1], [0, 0, 1, 1], [], []>} : vector<8x32xf32>, vector<32x256xf32>, vector<8x256xf32> -> vector<8x256xf32>
    %222 = vector.extract_strided_slice %221 {offsets = [0, 0], sizes = [8, 128], strides = [1, 1]} : vector<8x256xf32> to vector<8x128xf32>
    %223 = vector.extract_strided_slice %221 {offsets = [0, 128], sizes = [8, 128], strides = [1, 1]} : vector<8x256xf32> to vector<8x128xf32>
    %224 = vector.shape_cast %14 : vector<8x1xi1> to vector<8x1xi1>
    %225 = vector.broadcast %224 : vector<8x1xi1> to vector<8x128xi1>
    %226 = arith.select %225, %222, %223 : vector<8x128xi1>, vector<8x128xf32>
    %227 = arith.addf %226, %201 : vector<8x128xf32>
    %228 = arith.addf %227, %3 : vector<8x128xf32>
    %229 = math.tanh %228 : vector<8x128xf32>
    %230 = arith.negf %228 : vector<8x128xf32>
    %231 = math.exp %230 : vector<8x128xf32>
    %cst_38 = arith.constant 1.000000e+00 : f32
    %232 = vector.broadcast %cst_38 : f32 to vector<8x128xf32>
    %233 = arith.addf %232, %231 : vector<8x128xf32>
    %234 = arith.divf %232, %233 : vector<8x128xf32>
    %235 = arith.select %20, %229, %234 : vector<8x128xi1>, vector<8x128xf32>
    %236 = vector.extract_strided_slice %235 {offsets = [0, 0], sizes = [8, 32], strides = [1, 1]} : vector<8x128xf32> to vector<8x32xf32>
    %237 = vector.extract_strided_slice %235 {offsets = [0, 32], sizes = [8, 32], strides = [1, 1]} : vector<8x128xf32> to vector<8x32xf32>
    %238 = vector.extract_strided_slice %235 {offsets = [0, 64], sizes = [8, 32], strides = [1, 1]} : vector<8x128xf32> to vector<8x32xf32>
    %239 = vector.extract_strided_slice %235 {offsets = [0, 96], sizes = [8, 32], strides = [1, 1]} : vector<8x128xf32> to vector<8x32xf32>
    %240 = arith.mulf %237, %186 : vector<8x32xf32>
    %241 = arith.mulf %236, %238 : vector<8x32xf32>
    %242 = arith.addf %240, %241 : vector<8x32xf32>
    %243 = math.tanh %242 : vector<8x32xf32>
    %244 = arith.mulf %239, %243 : vector<8x32xf32>
    %245 = tpu.concatenate %220, %244 in 1 : vector<8x32xf32>, vector<8x32xf32> -> vector<8x64xf32>
    %c3 = arith.constant 3 : index
    %c0_39 = arith.constant 0 : index
    %c0_40 = arith.constant 0 : index
    %246 = vector.load %arg6[%c3, %c0_39, %c0_40] : memref<8x8x64xf32, #tpu.memory_space<vmem>>, vector<1x8x64xf32>
    %247 = vector.shape_cast %246 : vector<1x8x64xf32> to vector<8x64xf32>
    %248 = vector.shape_cast %245 : vector<8x64xf32> to vector<1x8x64xf32>
    tpu.vector_store %arg6[%c3, %c0_39, %c0_40], %248 {strides = array<i32>} : memref<8x8x64xf32, #tpu.memory_space<vmem>>, vector<1x8x64xf32>,
    %249 = tpu.concatenate %220, %244 in 1 : vector<8x32xf32>, vector<8x32xf32> -> vector<8x64xf32>
    %cst_41 = arith.constant dense<0.000000e+00> : vector<8x512xf32>
    %250 = tpu.matmul %249, %1, %cst_41 {dimension_numbers = #tpu.dot_dimension_numbers<[1], [0], [0], [1], [0, 0, 1, 1], [], []>} : vector<8x64xf32>, vector<64x512xf32>, vector<8x512xf32> -> vector<8x512xf32>
    %251 = vector.extract_strided_slice %250 {offsets = [0, 0], sizes = [8, 256], strides = [1, 1]} : vector<8x512xf32> to vector<8x256xf32>
    %252 = vector.extract_strided_slice %250 {offsets = [0, 256], sizes = [8, 256], strides = [1, 1]} : vector<8x512xf32> to vector<8x256xf32>
    %253 = vector.shape_cast %14 : vector<8x1xi1> to vector<8x1xi1>
    %254 = vector.broadcast %253 : vector<8x1xi1> to vector<8x256xi1>
    %255 = arith.select %254, %251, %252 : vector<8x256xi1>, vector<8x256xf32>
    %256 = vector.extract_strided_slice %255 {offsets = [0, 0], sizes = [8, 128], strides = [1, 1]} : vector<8x256xf32> to vector<8x128xf32>
    %257 = vector.extract_strided_slice %255 {offsets = [0, 128], sizes = [8, 128], strides = [1, 1]} : vector<8x256xf32> to vector<8x128xf32>
    %258 = vector.extract_strided_slice %11 {offsets = [4, 0, 0], sizes = [1, 8, 128], strides = [1, 1, 1]} : vector<8x8x128xf32> to vector<1x8x128xf32>
    %259 = vector.shape_cast %258 : vector<1x8x128xf32> to vector<8x128xf32>
    %260 = arith.addf %259, %256 : vector<8x128xf32>
    %261 = math.tanh %260 : vector<8x128xf32>
    %262 = arith.negf %260 : vector<8x128xf32>
    %263 = math.exp %262 : vector<8x128xf32>
    %cst_42 = arith.constant 1.000000e+00 : f32
    %264 = vector.broadcast %cst_42 : f32 to vector<8x128xf32>
    %265 = arith.addf %264, %263 : vector<8x128xf32>
    %266 = arith.divf %264, %265 : vector<8x128xf32>
    %267 = arith.select %20, %261, %266 : vector<8x128xi1>, vector<8x128xf32>
    %268 = vector.extract_strided_slice %267 {offsets = [0, 0], sizes = [8, 32], strides = [1, 1]} : vector<8x128xf32> to vector<8x32xf32>
    %269 = vector.extract_strided_slice %267 {offsets = [0, 32], sizes = [8, 32], strides = [1, 1]} : vector<8x128xf32> to vector<8x32xf32>
    %270 = vector.extract_strided_slice %267 {offsets = [0, 64], sizes = [8, 32], strides = [1, 1]} : vector<8x128xf32> to vector<8x32xf32>
    %271 = vector.extract_strided_slice %267 {offsets = [0, 96], sizes = [8, 32], strides = [1, 1]} : vector<8x128xf32> to vector<8x32xf32>
    %272 = arith.mulf %269, %218 : vector<8x32xf32>
    %273 = arith.mulf %268, %270 : vector<8x32xf32>
    %274 = arith.addf %272, %273 : vector<8x32xf32>
    %275 = math.tanh %274 : vector<8x32xf32>
    %276 = arith.mulf %271, %275 : vector<8x32xf32>
    %cst_43 = arith.constant dense<0.000000e+00> : vector<8x256xf32>
    %277 = tpu.matmul %276, %2, %cst_43 {dimension_numbers = #tpu.dot_dimension_numbers<[1], [0], [0], [1], [0, 0, 1, 1], [], []>} : vector<8x32xf32>, vector<32x256xf32>, vector<8x256xf32> -> vector<8x256xf32>
    %278 = vector.extract_strided_slice %277 {offsets = [0, 0], sizes = [8, 128], strides = [1, 1]} : vector<8x256xf32> to vector<8x128xf32>
    %279 = vector.extract_strided_slice %277 {offsets = [0, 128], sizes = [8, 128], strides = [1, 1]} : vector<8x256xf32> to vector<8x128xf32>
    %280 = vector.shape_cast %14 : vector<8x1xi1> to vector<8x1xi1>
    %281 = vector.broadcast %280 : vector<8x1xi1> to vector<8x128xi1>
    %282 = arith.select %281, %278, %279 : vector<8x128xi1>, vector<8x128xf32>
    %283 = arith.addf %282, %257 : vector<8x128xf32>
    %284 = arith.addf %283, %3 : vector<8x128xf32>
    %285 = math.tanh %284 : vector<8x128xf32>
    %286 = arith.negf %284 : vector<8x128xf32>
    %287 = math.exp %286 : vector<8x128xf32>
    %cst_44 = arith.constant 1.000000e+00 : f32
    %288 = vector.broadcast %cst_44 : f32 to vector<8x128xf32>
    %289 = arith.addf %288, %287 : vector<8x128xf32>
    %290 = arith.divf %288, %289 : vector<8x128xf32>
    %291 = arith.select %20, %285, %290 : vector<8x128xi1>, vector<8x128xf32>
    %292 = vector.extract_strided_slice %291 {offsets = [0, 0], sizes = [8, 32], strides = [1, 1]} : vector<8x128xf32> to vector<8x32xf32>
    %293 = vector.extract_strided_slice %291 {offsets = [0, 32], sizes = [8, 32], strides = [1, 1]} : vector<8x128xf32> to vector<8x32xf32>
    %294 = vector.extract_strided_slice %291 {offsets = [0, 64], sizes = [8, 32], strides = [1, 1]} : vector<8x128xf32> to vector<8x32xf32>
    %295 = vector.extract_strided_slice %291 {offsets = [0, 96], sizes = [8, 32], strides = [1, 1]} : vector<8x128xf32> to vector<8x32xf32>
    %296 = arith.mulf %293, %242 : vector<8x32xf32>
    %297 = arith.mulf %292, %294 : vector<8x32xf32>
    %298 = arith.addf %296, %297 : vector<8x32xf32>
    %299 = math.tanh %298 : vector<8x32xf32>
    %300 = arith.mulf %295, %299 : vector<8x32xf32>
    %301 = tpu.concatenate %276, %300 in 1 : vector<8x32xf32>, vector<8x32xf32> -> vector<8x64xf32>
    %c4 = arith.constant 4 : index
    %c0_45 = arith.constant 0 : index
    %c0_46 = arith.constant 0 : index
    %302 = vector.load %arg6[%c4, %c0_45, %c0_46] : memref<8x8x64xf32, #tpu.memory_space<vmem>>, vector<1x8x64xf32>
    %303 = vector.shape_cast %302 : vector<1x8x64xf32> to vector<8x64xf32>
    %304 = vector.shape_cast %301 : vector<8x64xf32> to vector<1x8x64xf32>
    tpu.vector_store %arg6[%c4, %c0_45, %c0_46], %304 {strides = array<i32>} : memref<8x8x64xf32, #tpu.memory_space<vmem>>, vector<1x8x64xf32>,
    %305 = tpu.concatenate %276, %300 in 1 : vector<8x32xf32>, vector<8x32xf32> -> vector<8x64xf32>
    %cst_47 = arith.constant dense<0.000000e+00> : vector<8x512xf32>
    %306 = tpu.matmul %305, %1, %cst_47 {dimension_numbers = #tpu.dot_dimension_numbers<[1], [0], [0], [1], [0, 0, 1, 1], [], []>} : vector<8x64xf32>, vector<64x512xf32>, vector<8x512xf32> -> vector<8x512xf32>
    %307 = vector.extract_strided_slice %306 {offsets = [0, 0], sizes = [8, 256], strides = [1, 1]} : vector<8x512xf32> to vector<8x256xf32>
    %308 = vector.extract_strided_slice %306 {offsets = [0, 256], sizes = [8, 256], strides = [1, 1]} : vector<8x512xf32> to vector<8x256xf32>
    %309 = vector.shape_cast %14 : vector<8x1xi1> to vector<8x1xi1>
    %310 = vector.broadcast %309 : vector<8x1xi1> to vector<8x256xi1>
    %311 = arith.select %310, %307, %308 : vector<8x256xi1>, vector<8x256xf32>
    %312 = vector.extract_strided_slice %311 {offsets = [0, 0], sizes = [8, 128], strides = [1, 1]} : vector<8x256xf32> to vector<8x128xf32>
    %313 = vector.extract_strided_slice %311 {offsets = [0, 128], sizes = [8, 128], strides = [1, 1]} : vector<8x256xf32> to vector<8x128xf32>
    %314 = vector.extract_strided_slice %11 {offsets = [5, 0, 0], sizes = [1, 8, 128], strides = [1, 1, 1]} : vector<8x8x128xf32> to vector<1x8x128xf32>
    %315 = vector.shape_cast %314 : vector<1x8x128xf32> to vector<8x128xf32>
    %316 = arith.addf %315, %312 : vector<8x128xf32>
    %317 = math.tanh %316 : vector<8x128xf32>
    %318 = arith.negf %316 : vector<8x128xf32>
    %319 = math.exp %318 : vector<8x128xf32>
    %cst_48 = arith.constant 1.000000e+00 : f32
    %320 = vector.broadcast %cst_48 : f32 to vector<8x128xf32>
    %321 = arith.addf %320, %319 : vector<8x128xf32>
    %322 = arith.divf %320, %321 : vector<8x128xf32>
    %323 = arith.select %20, %317, %322 : vector<8x128xi1>, vector<8x128xf32>
    %324 = vector.extract_strided_slice %323 {offsets = [0, 0], sizes = [8, 32], strides = [1, 1]} : vector<8x128xf32> to vector<8x32xf32>
    %325 = vector.extract_strided_slice %323 {offsets = [0, 32], sizes = [8, 32], strides = [1, 1]} : vector<8x128xf32> to vector<8x32xf32>
    %326 = vector.extract_strided_slice %323 {offsets = [0, 64], sizes = [8, 32], strides = [1, 1]} : vector<8x128xf32> to vector<8x32xf32>
    %327 = vector.extract_strided_slice %323 {offsets = [0, 96], sizes = [8, 32], strides = [1, 1]} : vector<8x128xf32> to vector<8x32xf32>
    %328 = arith.mulf %325, %274 : vector<8x32xf32>
    %329 = arith.mulf %324, %326 : vector<8x32xf32>
    %330 = arith.addf %328, %329 : vector<8x32xf32>
    %331 = math.tanh %330 : vector<8x32xf32>
    %332 = arith.mulf %327, %331 : vector<8x32xf32>
    %cst_49 = arith.constant dense<0.000000e+00> : vector<8x256xf32>
    %333 = tpu.matmul %332, %2, %cst_49 {dimension_numbers = #tpu.dot_dimension_numbers<[1], [0], [0], [1], [0, 0, 1, 1], [], []>} : vector<8x32xf32>, vector<32x256xf32>, vector<8x256xf32> -> vector<8x256xf32>
    %334 = vector.extract_strided_slice %333 {offsets = [0, 0], sizes = [8, 128], strides = [1, 1]} : vector<8x256xf32> to vector<8x128xf32>
    %335 = vector.extract_strided_slice %333 {offsets = [0, 128], sizes = [8, 128], strides = [1, 1]} : vector<8x256xf32> to vector<8x128xf32>
    %336 = vector.shape_cast %14 : vector<8x1xi1> to vector<8x1xi1>
    %337 = vector.broadcast %336 : vector<8x1xi1> to vector<8x128xi1>
    %338 = arith.select %337, %334, %335 : vector<8x128xi1>, vector<8x128xf32>
    %339 = arith.addf %338, %313 : vector<8x128xf32>
    %340 = arith.addf %339, %3 : vector<8x128xf32>
    %341 = math.tanh %340 : vector<8x128xf32>
    %342 = arith.negf %340 : vector<8x128xf32>
    %343 = math.exp %342 : vector<8x128xf32>
    %cst_50 = arith.constant 1.000000e+00 : f32
    %344 = vector.broadcast %cst_50 : f32 to vector<8x128xf32>
    %345 = arith.addf %344, %343 : vector<8x128xf32>
    %346 = arith.divf %344, %345 : vector<8x128xf32>
    %347 = arith.select %20, %341, %346 : vector<8x128xi1>, vector<8x128xf32>
    %348 = vector.extract_strided_slice %347 {offsets = [0, 0], sizes = [8, 32], strides = [1, 1]} : vector<8x128xf32> to vector<8x32xf32>
    %349 = vector.extract_strided_slice %347 {offsets = [0, 32], sizes = [8, 32], strides = [1, 1]} : vector<8x128xf32> to vector<8x32xf32>
    %350 = vector.extract_strided_slice %347 {offsets = [0, 64], sizes = [8, 32], strides = [1, 1]} : vector<8x128xf32> to vector<8x32xf32>
    %351 = vector.extract_strided_slice %347 {offsets = [0, 96], sizes = [8, 32], strides = [1, 1]} : vector<8x128xf32> to vector<8x32xf32>
    %352 = arith.mulf %349, %298 : vector<8x32xf32>
    %353 = arith.mulf %348, %350 : vector<8x32xf32>
    %354 = arith.addf %352, %353 : vector<8x32xf32>
    %355 = math.tanh %354 : vector<8x32xf32>
    %356 = arith.mulf %351, %355 : vector<8x32xf32>
    %357 = tpu.concatenate %332, %356 in 1 : vector<8x32xf32>, vector<8x32xf32> -> vector<8x64xf32>
    %c5 = arith.constant 5 : index
    %c0_51 = arith.constant 0 : index
    %c0_52 = arith.constant 0 : index
    %358 = vector.load %arg6[%c5, %c0_51, %c0_52] : memref<8x8x64xf32, #tpu.memory_space<vmem>>, vector<1x8x64xf32>
    %359 = vector.shape_cast %358 : vector<1x8x64xf32> to vector<8x64xf32>
    %360 = vector.shape_cast %357 : vector<8x64xf32> to vector<1x8x64xf32>
    tpu.vector_store %arg6[%c5, %c0_51, %c0_52], %360 {strides = array<i32>} : memref<8x8x64xf32, #tpu.memory_space<vmem>>, vector<1x8x64xf32>,
    %361 = tpu.concatenate %332, %356 in 1 : vector<8x32xf32>, vector<8x32xf32> -> vector<8x64xf32>
    %cst_53 = arith.constant dense<0.000000e+00> : vector<8x512xf32>
    %362 = tpu.matmul %361, %1, %cst_53 {dimension_numbers = #tpu.dot_dimension_numbers<[1], [0], [0], [1], [0, 0, 1, 1], [], []>} : vector<8x64xf32>, vector<64x512xf32>, vector<8x512xf32> -> vector<8x512xf32>
    %363 = vector.extract_strided_slice %362 {offsets = [0, 0], sizes = [8, 256], strides = [1, 1]} : vector<8x512xf32> to vector<8x256xf32>
    %364 = vector.extract_strided_slice %362 {offsets = [0, 256], sizes = [8, 256], strides = [1, 1]} : vector<8x512xf32> to vector<8x256xf32>
    %365 = vector.shape_cast %14 : vector<8x1xi1> to vector<8x1xi1>
    %366 = vector.broadcast %365 : vector<8x1xi1> to vector<8x256xi1>
    %367 = arith.select %366, %363, %364 : vector<8x256xi1>, vector<8x256xf32>
    %368 = vector.extract_strided_slice %367 {offsets = [0, 0], sizes = [8, 128], strides = [1, 1]} : vector<8x256xf32> to vector<8x128xf32>
    %369 = vector.extract_strided_slice %367 {offsets = [0, 128], sizes = [8, 128], strides = [1, 1]} : vector<8x256xf32> to vector<8x128xf32>
    %370 = vector.extract_strided_slice %11 {offsets = [6, 0, 0], sizes = [1, 8, 128], strides = [1, 1, 1]} : vector<8x8x128xf32> to vector<1x8x128xf32>
    %371 = vector.shape_cast %370 : vector<1x8x128xf32> to vector<8x128xf32>
    %372 = arith.addf %371, %368 : vector<8x128xf32>
    %373 = math.tanh %372 : vector<8x128xf32>
    %374 = arith.negf %372 : vector<8x128xf32>
    %375 = math.exp %374 : vector<8x128xf32>
    %cst_54 = arith.constant 1.000000e+00 : f32
    %376 = vector.broadcast %cst_54 : f32 to vector<8x128xf32>
    %377 = arith.addf %376, %375 : vector<8x128xf32>
    %378 = arith.divf %376, %377 : vector<8x128xf32>
    %379 = arith.select %20, %373, %378 : vector<8x128xi1>, vector<8x128xf32>
    %380 = vector.extract_strided_slice %379 {offsets = [0, 0], sizes = [8, 32], strides = [1, 1]} : vector<8x128xf32> to vector<8x32xf32>
    %381 = vector.extract_strided_slice %379 {offsets = [0, 32], sizes = [8, 32], strides = [1, 1]} : vector<8x128xf32> to vector<8x32xf32>
    %382 = vector.extract_strided_slice %379 {offsets = [0, 64], sizes = [8, 32], strides = [1, 1]} : vector<8x128xf32> to vector<8x32xf32>
    %383 = vector.extract_strided_slice %379 {offsets = [0, 96], sizes = [8, 32], strides = [1, 1]} : vector<8x128xf32> to vector<8x32xf32>
    %384 = arith.mulf %381, %330 : vector<8x32xf32>
    %385 = arith.mulf %380, %382 : vector<8x32xf32>
    %386 = arith.addf %384, %385 : vector<8x32xf32>
    %387 = math.tanh %386 : vector<8x32xf32>
    %388 = arith.mulf %383, %387 : vector<8x32xf32>
    %cst_55 = arith.constant dense<0.000000e+00> : vector<8x256xf32>
    %389 = tpu.matmul %388, %2, %cst_55 {dimension_numbers = #tpu.dot_dimension_numbers<[1], [0], [0], [1], [0, 0, 1, 1], [], []>} : vector<8x32xf32>, vector<32x256xf32>, vector<8x256xf32> -> vector<8x256xf32>
    %390 = vector.extract_strided_slice %389 {offsets = [0, 0], sizes = [8, 128], strides = [1, 1]} : vector<8x256xf32> to vector<8x128xf32>
    %391 = vector.extract_strided_slice %389 {offsets = [0, 128], sizes = [8, 128], strides = [1, 1]} : vector<8x256xf32> to vector<8x128xf32>
    %392 = vector.shape_cast %14 : vector<8x1xi1> to vector<8x1xi1>
    %393 = vector.broadcast %392 : vector<8x1xi1> to vector<8x128xi1>
    %394 = arith.select %393, %390, %391 : vector<8x128xi1>, vector<8x128xf32>
    %395 = arith.addf %394, %369 : vector<8x128xf32>
    %396 = arith.addf %395, %3 : vector<8x128xf32>
    %397 = math.tanh %396 : vector<8x128xf32>
    %398 = arith.negf %396 : vector<8x128xf32>
    %399 = math.exp %398 : vector<8x128xf32>
    %cst_56 = arith.constant 1.000000e+00 : f32
    %400 = vector.broadcast %cst_56 : f32 to vector<8x128xf32>
    %401 = arith.addf %400, %399 : vector<8x128xf32>
    %402 = arith.divf %400, %401 : vector<8x128xf32>
    %403 = arith.select %20, %397, %402 : vector<8x128xi1>, vector<8x128xf32>
    %404 = vector.extract_strided_slice %403 {offsets = [0, 0], sizes = [8, 32], strides = [1, 1]} : vector<8x128xf32> to vector<8x32xf32>
    %405 = vector.extract_strided_slice %403 {offsets = [0, 32], sizes = [8, 32], strides = [1, 1]} : vector<8x128xf32> to vector<8x32xf32>
    %406 = vector.extract_strided_slice %403 {offsets = [0, 64], sizes = [8, 32], strides = [1, 1]} : vector<8x128xf32> to vector<8x32xf32>
    %407 = vector.extract_strided_slice %403 {offsets = [0, 96], sizes = [8, 32], strides = [1, 1]} : vector<8x128xf32> to vector<8x32xf32>
    %408 = arith.mulf %405, %354 : vector<8x32xf32>
    %409 = arith.mulf %404, %406 : vector<8x32xf32>
    %410 = arith.addf %408, %409 : vector<8x32xf32>
    %411 = math.tanh %410 : vector<8x32xf32>
    %412 = arith.mulf %407, %411 : vector<8x32xf32>
    %413 = tpu.concatenate %388, %412 in 1 : vector<8x32xf32>, vector<8x32xf32> -> vector<8x64xf32>
    %c6 = arith.constant 6 : index
    %c0_57 = arith.constant 0 : index
    %c0_58 = arith.constant 0 : index
    %414 = vector.load %arg6[%c6, %c0_57, %c0_58] : memref<8x8x64xf32, #tpu.memory_space<vmem>>, vector<1x8x64xf32>
    %415 = vector.shape_cast %414 : vector<1x8x64xf32> to vector<8x64xf32>
    %416 = vector.shape_cast %413 : vector<8x64xf32> to vector<1x8x64xf32>
    tpu.vector_store %arg6[%c6, %c0_57, %c0_58], %416 {strides = array<i32>} : memref<8x8x64xf32, #tpu.memory_space<vmem>>, vector<1x8x64xf32>,
    %417 = tpu.concatenate %388, %412 in 1 : vector<8x32xf32>, vector<8x32xf32> -> vector<8x64xf32>
    %cst_59 = arith.constant dense<0.000000e+00> : vector<8x512xf32>
    %418 = tpu.matmul %417, %1, %cst_59 {dimension_numbers = #tpu.dot_dimension_numbers<[1], [0], [0], [1], [0, 0, 1, 1], [], []>} : vector<8x64xf32>, vector<64x512xf32>, vector<8x512xf32> -> vector<8x512xf32>
    %419 = vector.extract_strided_slice %418 {offsets = [0, 0], sizes = [8, 256], strides = [1, 1]} : vector<8x512xf32> to vector<8x256xf32>
    %420 = vector.extract_strided_slice %418 {offsets = [0, 256], sizes = [8, 256], strides = [1, 1]} : vector<8x512xf32> to vector<8x256xf32>
    %421 = vector.shape_cast %14 : vector<8x1xi1> to vector<8x1xi1>
    %422 = vector.broadcast %421 : vector<8x1xi1> to vector<8x256xi1>
    %423 = arith.select %422, %419, %420 : vector<8x256xi1>, vector<8x256xf32>
    %424 = vector.extract_strided_slice %423 {offsets = [0, 0], sizes = [8, 128], strides = [1, 1]} : vector<8x256xf32> to vector<8x128xf32>
    %425 = vector.extract_strided_slice %423 {offsets = [0, 128], sizes = [8, 128], strides = [1, 1]} : vector<8x256xf32> to vector<8x128xf32>
    %426 = vector.extract_strided_slice %11 {offsets = [7, 0, 0], sizes = [1, 8, 128], strides = [1, 1, 1]} : vector<8x8x128xf32> to vector<1x8x128xf32>
    %427 = vector.shape_cast %426 : vector<1x8x128xf32> to vector<8x128xf32>
    %428 = arith.addf %427, %424 : vector<8x128xf32>
    %429 = math.tanh %428 : vector<8x128xf32>
    %430 = arith.negf %428 : vector<8x128xf32>
    %431 = math.exp %430 : vector<8x128xf32>
    %cst_60 = arith.constant 1.000000e+00 : f32
    %432 = vector.broadcast %cst_60 : f32 to vector<8x128xf32>
    %433 = arith.addf %432, %431 : vector<8x128xf32>
    %434 = arith.divf %432, %433 : vector<8x128xf32>
    %435 = arith.select %20, %429, %434 : vector<8x128xi1>, vector<8x128xf32>
    %436 = vector.extract_strided_slice %435 {offsets = [0, 0], sizes = [8, 32], strides = [1, 1]} : vector<8x128xf32> to vector<8x32xf32>
    %437 = vector.extract_strided_slice %435 {offsets = [0, 32], sizes = [8, 32], strides = [1, 1]} : vector<8x128xf32> to vector<8x32xf32>
    %438 = vector.extract_strided_slice %435 {offsets = [0, 64], sizes = [8, 32], strides = [1, 1]} : vector<8x128xf32> to vector<8x32xf32>
    %439 = vector.extract_strided_slice %435 {offsets = [0, 96], sizes = [8, 32], strides = [1, 1]} : vector<8x128xf32> to vector<8x32xf32>
    %440 = arith.mulf %437, %386 : vector<8x32xf32>
    %441 = arith.mulf %436, %438 : vector<8x32xf32>
    %442 = arith.addf %440, %441 : vector<8x32xf32>
    %443 = math.tanh %442 : vector<8x32xf32>
    %444 = arith.mulf %439, %443 : vector<8x32xf32>
    %cst_61 = arith.constant dense<0.000000e+00> : vector<8x256xf32>
    %445 = tpu.matmul %444, %2, %cst_61 {dimension_numbers = #tpu.dot_dimension_numbers<[1], [0], [0], [1], [0, 0, 1, 1], [], []>} : vector<8x32xf32>, vector<32x256xf32>, vector<8x256xf32> -> vector<8x256xf32>
    %446 = vector.extract_strided_slice %445 {offsets = [0, 0], sizes = [8, 128], strides = [1, 1]} : vector<8x256xf32> to vector<8x128xf32>
    %447 = vector.extract_strided_slice %445 {offsets = [0, 128], sizes = [8, 128], strides = [1, 1]} : vector<8x256xf32> to vector<8x128xf32>
    %448 = vector.shape_cast %14 : vector<8x1xi1> to vector<8x1xi1>
    %449 = vector.broadcast %448 : vector<8x1xi1> to vector<8x128xi1>
    %450 = arith.select %449, %446, %447 : vector<8x128xi1>, vector<8x128xf32>
    %451 = arith.addf %450, %425 : vector<8x128xf32>
    %452 = arith.addf %451, %3 : vector<8x128xf32>
    %453 = math.tanh %452 : vector<8x128xf32>
    %454 = arith.negf %452 : vector<8x128xf32>
    %455 = math.exp %454 : vector<8x128xf32>
    %cst_62 = arith.constant 1.000000e+00 : f32
    %456 = vector.broadcast %cst_62 : f32 to vector<8x128xf32>
    %457 = arith.addf %456, %455 : vector<8x128xf32>
    %458 = arith.divf %456, %457 : vector<8x128xf32>
    %459 = arith.select %20, %453, %458 : vector<8x128xi1>, vector<8x128xf32>
    %460 = vector.extract_strided_slice %459 {offsets = [0, 0], sizes = [8, 32], strides = [1, 1]} : vector<8x128xf32> to vector<8x32xf32>
    %461 = vector.extract_strided_slice %459 {offsets = [0, 32], sizes = [8, 32], strides = [1, 1]} : vector<8x128xf32> to vector<8x32xf32>
    %462 = vector.extract_strided_slice %459 {offsets = [0, 64], sizes = [8, 32], strides = [1, 1]} : vector<8x128xf32> to vector<8x32xf32>
    %463 = vector.extract_strided_slice %459 {offsets = [0, 96], sizes = [8, 32], strides = [1, 1]} : vector<8x128xf32> to vector<8x32xf32>
    %464 = arith.mulf %461, %410 : vector<8x32xf32>
    %465 = arith.mulf %460, %462 : vector<8x32xf32>
    %466 = arith.addf %464, %465 : vector<8x32xf32>
    %467 = math.tanh %466 : vector<8x32xf32>
    %468 = arith.mulf %463, %467 : vector<8x32xf32>
    %469 = tpu.concatenate %444, %468 in 1 : vector<8x32xf32>, vector<8x32xf32> -> vector<8x64xf32>
    %c7 = arith.constant 7 : index
    %c0_63 = arith.constant 0 : index
    %c0_64 = arith.constant 0 : index
    %470 = vector.load %arg6[%c7, %c0_63, %c0_64] : memref<8x8x64xf32, #tpu.memory_space<vmem>>, vector<1x8x64xf32>
    %471 = vector.shape_cast %470 : vector<1x8x64xf32> to vector<8x64xf32>
    %472 = vector.shape_cast %469 : vector<8x64xf32> to vector<1x8x64xf32>
    tpu.vector_store %arg6[%c7, %c0_63, %c0_64], %472 {strides = array<i32>} : memref<8x8x64xf32, #tpu.memory_space<vmem>>, vector<1x8x64xf32>,
    return
  }
}

</mosaic_0001>

<bundles_post_ra>
// kernel: elmo_embeddings_forward.1
= control target key start
LH: loop header
LB: loop body
LE: loop exit
PB: predicated region body
PF: predicated region fallthrough
CT: control target
= control target key end

     0   :  { %vm80_vm0 = vcmask 523264   ;;  %v3944_v2 = vmov 0.0   ;;  %v219_v56 = vlaneseq  ;;  %s2784_s19 = smov 32   ;;  %vm405_vm5 = vcmask 261120   ;;  %s3937_s1 = inlined_call_operand.vmem [shape: f32[64,128], index: 1, kind: input, shape index: {}]   ;;  %s3938_s0 = inlined_call_operand.vmem [shape: f32[8,8,64], index: 0, kind: input, shape index: {}]   ;;  %s3939_s2 = inlined_call_operand.vmem [shape: f32[64,512], index: 2, kind: input, shape index: {}]   ;;  %s3940_s4 = inlined_call_operand.vmem [shape: f32[8,128], index: 4, kind: input, shape index: {}]   ;;  %s3941_s3 = inlined_call_operand.vmem [shape: f32[32,256], index: 3, kind: input, shape index: {}]   ;;  %s3942_s5 = inlined_call_operand.vmem [shape: f32[8,128], index: 5, kind: input, shape index: {}]   ;;  %s3943_s6 = inlined_call_operand.vmem [shape: f32[8,8,64], index: 6, kind: output, shape index: {}]  }
   0x1   :  { %v30_v0 = vld [vmem:[%s3937_s1 + $0x38] sm:$0xff]  ;;  %v29_v1 = vld [vmem:[%s3937_s1 + $0x30] sm:$0xff]  ;;  %294 = vmatprep.mubr.f32.mxu1 %v3944_v2  ;;  %v28_v3 = vld [vmem:[%s3937_s1 + $0x28] sm:$0xff] }
   0x2   :  { %2582 = vmatprep.subr.mxu0 %v30_v0  ;;  %v72_v4 = vld [vmem:[%s3938_s0] sm:$0xff]  ;;  %v2837_v5 = vld [vmem:[%s3939_s2 + $0xe8] sm:$0xff]  ;;  %v26_v10 = vld [vmem:[%s3937_s1 + $0x18] sm:$0xff]  ;;  %v3102_v61 = vshrl.u32 %v219_v56, 7 }
   0x3   :  { %2583 = vmatpush3.msra.mxu0 %v30_v0  ;;  %2598 = vmatprep.mubr.msk.f32.mxu0 %vm80_vm0, %v72_v4  ;;  %v2842_v6 = vld [vmem:[%s3939_s2 + $0xe0] sm:$0xff]  ;;  %v2851_v8 = vld [vmem:[%s3939_s2 + $0xc8] sm:$0xff]  ;;  %v25_v14 = vld [vmem:[%s3937_s1 + $0x10] sm:$0xff] }
   0x4   :  { %2584 = vmatprep.subr.mxu0 %v29_v1  ;;  %v27_v7 = vld [vmem:[%s3937_s1 + $0x20] sm:$0xff]  ;;  %246 = vmatprep.subr.mxu1 %v2837_v5  ;;  %v2866_v11 = vld [vmem:[%s3939_s2 + $0xa8] sm:$0xff]  ;;  %v2930_v24 = vld [vmem:[%s3939_s2 + $0xf8] sm:$0xff]  ;;  %vm221_vm1 = vcmp.lt.s32.totalorder %v3102_v61, 4 }
   0x5   :  { %2585 = vmatpush3.msra.mxu0 %v29_v1  ;;  %247 = vmatpush1.msra.mxu1 %v2842_v6  ;;  %v2857_v9 = vld [vmem:[%s3939_s2 + $0xc0] sm:$0xff]  ;;  %v2877_v13 = vld [vmem:[%s3939_s2 + $0x88] sm:$0xff]  ;;  %v2936_v25 = vld [vmem:[%s3939_s2 + $0xf0] sm:$0xff] }
   0x6   :  { %2586 = vmatprep.subr.mxu0 %v28_v3  ;;  %248 = vmatprep.subr.mxu1 %v2851_v8  ;;  %v2872_v12 = vld [vmem:[%s3939_s2 + $0xa0] sm:$0xff]  ;;  %v2892_v16 = vld [vmem:[%s3939_s2 + $0x68] sm:$0xff]  ;;  %v74_v26 = vld [vmem:[%s3938_s0 + $0x10] sm:$0xff] }
   0x7   :  { %2587 = vmatpush3.msra.mxu0 %v28_v3  ;;  %249 = vmatpush1.msra.mxu1 %v2857_v9  ;;  %v2886_v15 = vld [vmem:[%s3939_s2 + $0x80] sm:$0xff]  ;;  %v24_v17 = vld [vmem:[%s3937_s1 + $0x8] sm:$0xff]  ;;  %v2945_v27 = vld [vmem:[%s3939_s2 + $0xd8] sm:$0xff] }
   0x8   :  { %2588 = vmatprep.subr.mxu0 %v27_v7  ;;  %250 = vmatprep.subr.mxu1 %v2866_v11  ;;  %v2901_v18 = vld [vmem:[%s3939_s2 + $0x60] sm:$0xff]  ;;  %v2907_v19 = vld [vmem:[%s3939_s2 + $0x48] sm:$0xff]  ;;  %v2958_v29 = vld [vmem:[%s3939_s2 + $0xd0] sm:$0xff] }
   0x9   :  { %2589 = vmatpush3.msra.mxu0 %v27_v7  ;;  %251 = vmatpush1.msra.mxu1 %v2872_v12  ;;  %v23_v20 = vld [vmem:[%s3937_s1] sm:$0xff]  ;;  %v2922_v22 = vld [vmem:[%s3939_s2 + $0x28] sm:$0xff]  ;;  %v75_v31 = vld [vmem:[%s3938_s0 + $0x18] sm:$0xff] }
   0xa   :  { %2590 = vmatprep.subr.mxu0 %v26_v10  ;;  %252 = vmatprep.subr.mxu1 %v2877_v13  ;;  %v2916_v21 = vld [vmem:[%s3939_s2 + $0x40] sm:$0xff]  ;;  %v73_v23 = vld [vmem:[%s3938_s0 + $0x8] sm:$0xff]  ;;  %v2973_v32 = vld [vmem:[%s3939_s2 + $0xb8] sm:$0xff] }
   0xb   :  { %2591 = vmatpush3.msra.mxu0 %v26_v10  ;;  %253 = vmatpush1.msra.mxu1 %v2886_v15  ;;  %v2951_v28 = vld [vmem:[%s3939_s2 + $0x20] sm:$0xff]  ;;  %v2963_v30 = vld [vmem:[%s3939_s2 + $0x8] sm:$0xff]  ;;  %v2979_v33 = vld [vmem:[%s3939_s2 + $0xb0] sm:$0xff] }
   0xc   :  { %2592 = vmatprep.subr.mxu0 %v25_v14  ;;  %254 = vmatprep.subr.mxu1 %v2892_v16  ;;  %v76_v34 = vld [vmem:[%s3938_s0 + $0x20] sm:$0xff]  ;;  %v2989_v35 = vld [vmem:[%s3939_s2 + $0x98] sm:$0xff]  ;;  %v3002_v37 = vld [vmem:[%s3939_s2 + $0x90] sm:$0xff] }
   0xd   :  { %2593 = vmatpush3.msra.mxu0 %v25_v14  ;;  %255 = vmatpush1.msra.mxu1 %v2901_v18  ;;  %v2995_v36 = vld [vmem:[%s3939_s2] sm:$0xff]  ;;  %v77_v38 = vld [vmem:[%s3938_s0 + $0x28] sm:$0xff]  ;;  %v3012_v39 = vld [vmem:[%s3939_s2 + $0x78] sm:$0xff] }
   0xe   :  { %2594 = vmatprep.subr.mxu0 %v24_v17  ;;  %256 = vmatprep.subr.mxu1 %v2907_v19  ;;  %v3018_v40 = vld [vmem:[%s3939_s2 + $0x70] sm:$0xff]  ;;  %v3028_v42 = vld [vmem:[%s3939_s2 + $0x58] sm:$0xff]  ;;  %v210_v49 = vld [vmem:[%s3940_s4] sm:$0xff]  ;;  %s2783_s4 = smov 64  }
   0xf   :  { %2595 = vmatpush3.msra.mxu0 %v24_v17  ;;  %257 = vmatpush1.msra.mxu1 %v2916_v21  ;;  %v78_v41 = vld [vmem:[%s3938_s0 + $0x30] sm:$0xff]  ;;  %v79_v44 = vld [vmem:[%s3938_s0 + $0x38] sm:$0xff] }
  0x10   :  { %2596 = vmatprep.subr.mxu0 %v23_v20  ;;  %258 = vmatprep.subr.mxu1 %v2922_v22  ;;  %v3036_v43 = vld [vmem:[%s3939_s2 + $0x50] sm:$0xff]  ;;  %v3046_v45 = vld [vmem:[%s3939_s2 + $0x38] sm:$0xff] }
  0x11   :  { %2597 = vmatpush3.msra.mxu0 %v23_v20  ;;  %259 = vmatpush1.msra.mxu1 %v2951_v28  ;;  %v3052_v46 = vld [vmem:[%s3939_s2 + $0x30] sm:$0xff]  ;;  %v3059_v47 = vld [vmem:[%s3939_s2 + $0x18] sm:$0xff] }
  0x12   :  { %2599 = vmatmul.mubr.msk.f32.vlgmr.msra.gmra.mxu0 %vm80_vm0, %v73_v23  ;;  %317 = vmatprep.subr.mxu0 %v2930_v24  ;;  %v3066_v48 = vld [vmem:[%s3939_s2 + $0x10] sm:$0xff] }
  0x13   :  { %318 = vmatpush1.msra.mxu0 %v2936_v25  ;;  %2601 = vmatprep.mubr.msk.f32.mxu0 %vm80_vm0, %v74_v26 }
  0x14   :  { %319 = vmatprep.subr.mxu0 %v2945_v27  ;;  %260 = vmatprep.subr.mxu1 %v2963_v30 }
  0x15   :  { %320 = vmatpush1.msra.mxu0 %v2958_v29  ;;  %261 = vmatpush1.msra.mxu1 %v2995_v36 }
  0x16   :  { %2602 = vmatmul.mubr.msk.f32.gmra.mxu0 %vm80_vm0, %v75_v31  ;;  %321 = vmatprep.subr.mxu0 %v2973_v32  ;;  %v223_v31 = vand.u32 127, %v219_v56  ;;  %v3127_v56 = vld [vmem:[%s3941_s3 + $0x38] sm:$0xff] }
  0x17   :  { %322 = vmatpush1.msra.mxu0 %v2979_v33  ;;  %2604 = vmatprep.mubr.msk.f32.mxu0 %vm80_vm0, %v76_v34 }
  0x18   :  { %323 = vmatprep.subr.mxu0 %v2989_v35  ;;  %295 = vmatmul.mubr.f32.vlgmr.msra.gmra.mxu1 %v3944_v2  ;;  %vm224_vm2 = vcmp.ge.s32.totalorder %v223_v31, 64  ;;  %vm225_vm3 = vcmp.lt.s32.totalorder %v223_v31, 96 }
  0x19   :  { %324 = vmatpush1.msra.mxu0 %v3002_v37  ;;  %472 = vmatprep.mubr.f32.mxu1 %v3944_v2  ;;  %vm3113_vm4 = vmand %vm224_vm2, %vm225_vm3 }
  0x1a   :  { %2605 = vmatmul.mubr.msk.f32.gmra.mxu0 %vm80_vm0, %v77_v38  ;;  %325 = vmatprep.subr.mxu0 %v3012_v39 }
  0x1b   :  { %326 = vmatpush1.msra.mxu0 %v3018_v40  ;;  %2607 = vmatprep.mubr.msk.f32.mxu0 %vm80_vm0, %v78_v41 }
  0x1c   :  { %327 = vmatprep.subr.mxu0 %v3028_v42  ;;  %432 = vmatprep.subr.mxu1 %v3127_v56 }
  0x1d   :  { %328 = vmatpush1.msra.mxu0 %v3036_v43 }
  0x1e   :  { %2608 = vmatmul.mubr.msk.f32.gmra.mxu0 %vm80_vm0, %v79_v44  ;;  %329 = vmatprep.subr.mxu0 %v3046_v45 }
  0x1f   :  { %330 = vmatpush1.msra.mxu0 %v3052_v46  ;;  %365 = vmatprep.mubr.f32.mxu0 %v3944_v2 }
  0x20   :  { %331 = vmatprep.subr.mxu0 %v3059_v47 }
  0x21   :  { %332 = vmatpush1.msra.mxu0 %v3066_v48 }
  0x22   :  { %366 = vmatmul.mubr.f32.vlgmr.msra.gmra.mxu0 %v3944_v2  ;;  %604 = vmatprep.subr.mxu0 %v2930_v24 }
  0x23   :  { %605 = vmatpush1.msra.mxu0 %v2936_v25  ;;  %652 = vmatprep.mubr.f32.mxu0 %v3944_v2 }
  0x24   :  { %606 = vmatprep.subr.mxu0 %v2945_v27 }
  0x25   :  { %607 = vmatpush1.msra.mxu0 %v2958_v29 }
  0x26   :  { %608 = vmatprep.subr.mxu0 %v2973_v32 }
  0x27   :  { %609 = vmatpush1.msra.mxu0 %v2979_v33 }
  0x28   :  { %610 = vmatprep.subr.mxu0 %v2989_v35 }
  0x29   :  { %611 = vmatpush1.msra.mxu0 %v3002_v37 }
  0x2a   :  { %612 = vmatprep.subr.mxu0 %v3012_v39 }
  0x2b   :  { %613 = vmatpush1.msra.mxu0 %v3018_v40 }
  0x2c   :  { %614 = vmatprep.subr.mxu0 %v3028_v42 }
  0x2d   :  { %615 = vmatpush1.msra.mxu0 %v3036_v43 }
  0x2e   :  { %616 = vmatprep.subr.mxu0 %v3046_v45 }
  0x2f   :  { %617 = vmatpush1.msra.mxu0 %v3052_v46 }
  0x30   :  { %618 = vmatprep.subr.mxu0 %v3059_v47 }
  0x31   :  { %619 = vmatpush1.msra.mxu0 %v3066_v48 }
  0x32   :  { %818 = vmatprep.subr.mxu0 %v2837_v5 }
  0xd2   :  { %v2600_v50 = vpop.f32.mrf.mxu0 }
  0xd3   :  { %v3094_v51 = vadd.f32 %v2600_v50, %v210_v49 }
  0xd4   :  { %v171_v52 = vpop.f32.mrf.mxu0 }
  0xd5   :  { %v211_v4 = vadd.f32 %v210_v49, %v171_v52 }
  0xd6   :  { %v2603_v53 = vpop.f32.mrf.mxu0 }
  0xd7   :  { %v3096_v54 = vadd.f32 %v2603_v53, %v210_v49 }
  0xd8   :  { %v181_v55 = vpop.f32.mrf.mxu0  ;;  %v296_v7 = vpop.f32.mrf.mxu1 }
  0xd9   :  { %v3098_v57 = vadd.f32 %v210_v49, %v181_v55 }
  0xda   :  { %v2606_v58 = vpop.f32.mrf.mxu0 }
  0xdb   :  { %v3100_v59 = vadd.f32 %v2606_v58, %v210_v49  ;;  %v3132_v58 = vld [vmem:[%s3941_s3 + $0x30] sm:$0xff] }
  0xdc   :  { %v191_v60 = vpop.f32.mrf.mxu0  ;;  %433 = vmatpush1.msra.mxu1 %v3132_v58 }
  0xdd   :  { %3946 = vst [vmem:[#allocation2_spill] sm:$0xff] %v3100_v59  ;;  %v3104_v62 = vadd.f32 %v210_v49, %v191_v60  ;;  %v3137_v60 = vld [vmem:[%s3941_s3 + $0x28] sm:$0xff] }
  0xde   :  { %v2609_v63 = vpop.f32.mrf.mxu0  ;;  %434 = vmatprep.subr.mxu1 %v3137_v60 }
  0xdf   :  { %v3106_v0 = vadd.f32 %v2609_v63, %v210_v49  ;;  %v3143_v63 = vld [vmem:[%s3941_s3 + $0x20] sm:$0xff] }
  0xe0   :  { %v201_v1 = vpop.f32.mrf.mxu0  ;;  %435 = vmatpush1.msra.mxu1 %v3143_v63 }
  0xe1   :  { %3947 = vst [vmem:[#allocation3_spill] sm:$0xff] %v3106_v0  ;;  %v3109_v3 = vadd.f32 %v210_v49, %v201_v1  ;;  %v3149_v1 = vld [vmem:[%s3941_s3 + $0x18] sm:$0xff] }
  0xe2   :  { %v367_v10 = vpop.f32.mrf.mxu0  ;;  %436 = vmatprep.subr.mxu1 %v3149_v1 }
  0xe3   :  { %3948 = vst [vmem:[#allocation4_spill] sm:$0xff] %v3109_v3  ;;  %v374_v14 = vsel %vm221_vm1, %v296_v7, %v367_v10  ;;  %v3161_v7 = vld [vmem:[%s3941_s3 + $0x8] sm:$0xff]  ;;  %v3167_v10 = vld [vmem:[%s3941_s3] sm:$0xff] }
  0xe4   :  { %v376_v17 = vadd.f32 %v374_v14, %v211_v4  ;;  %v3155_v4 = vld [vmem:[%s3941_s3 + $0x10] sm:$0xff]  ;;  %v369_v31 = vpop.f32.mrf.mxu0 }
  0xe5   :  { %437 = vmatpush1.msra.mxu1 %v3155_v4 }
  0xe6   :  { %v2521_v20 = vmul.f32 -1.442695, %v376_v17  ;;  %438 = vmatprep.subr.mxu1 %v3161_v7 }
  0xe7   :  { %439 = vmatpush1.msra.mxu1 %v3167_v10 }
  0xe8   :  { %2613 = vpow2.f32 %v2521_v20  ;;  %533 = vmatprep.subr.mxu1 %v2837_v5 }
  0xe9   :  { %2615 = vtanh.f32 %v376_v17 }
  0xf5   :  { %v2614_v23 = vpop.eup %2613 }
  0xf6   :  { %v381_v26 = vadd.f32 1.0, %v2614_v23  ;;  %v2616_v38 = vpop.eup %2615 }
  0xf8   :  { %2617 = vrcp.f32 %v381_v26  ;;  %v298_v26 = vpop.f32.mrf.mxu1 }
 0x105   :  { %v2618_v41 = vpop.eup %2617 }
 0x106   :  { %v384_v44 = vsel %vm3113_vm4, %v2616_v38, %v2618_v41 }
 0x107   :  { %387 = vrot.lane.b32.xlu0 %v384_v44, %s2783_s4  ;;  %v385_v52 = vmul.f32 0.0, %v384_v44 }
 0x179   :  { %v388_v49 = vpop.permute.xlu0 %387 }
 0x17a   :  { %v390_v50 = vmul.f32 %v388_v49, %v384_v44  ;;  %v3198_v49 = vld [vmem:[%s3942_s5] sm:$0xff] }
 0x17c   :  { %392 = vrot.lane.b32.xlu0 %v390_v50, %s2784_s19 }
 0x1ee   :  { %v393_v53 = vpop.permute.xlu0 %392 }
 0x1ef   :  { %v3121_v55 = vadd.f32 %v393_v53, %v385_v52 }
 0x1f1   :  { %2619 = vtanh.f32 %v3121_v55 }
 0x1fe   :  { %v2620_v14 = vpop.eup %2619 }
 0x1ff   :  { %398 = vrot.lane.b32.xlu1 %v2620_v14, %s2783_s4 }
 0x271   :  { %v399_v17 = vpop.permute.xlu1 %398 }
 0x272   :  { %v401_v20 = vmul.f32 %v399_v17, %v384_v44  ;;  %v375_v44 = vsel %vm221_vm1, %v298_v26, %v369_v31 }
 0x274   :  { %403 = vrot.lane.b32.xlu1 %v401_v20, %s2784_s19 }
 0x2e6   :  { %v404_v23 = vpop.permute.xlu1 %403 }
 0x2e7   :  { %2522 = vmatmul.mubr.msk.f32.vlgmr.msra.gmra.mxu1 %vm405_vm5, %v404_v23 }
 0x2e8   :  { %534 = vmatpush1.msra.mxu1 %v2842_v6  ;;  %581 = vmatprep.mubr.f32.mxu1 %v3944_v2 }
 0x2e9   :  { %535 = vmatprep.subr.mxu1 %v2851_v8 }
 0x2ea   :  { %536 = vmatpush1.msra.mxu1 %v2857_v9 }
 0x2eb   :  { %537 = vmatprep.subr.mxu1 %v2866_v11 }
 0x2ec   :  { %538 = vmatpush1.msra.mxu1 %v2872_v12 }
 0x2ed   :  { %539 = vmatprep.subr.mxu1 %v2877_v13 }
 0x2ee   :  { %540 = vmatpush1.msra.mxu1 %v2886_v15 }
 0x2ef   :  { %541 = vmatprep.subr.mxu1 %v2892_v16 }
 0x2f0   :  { %542 = vmatpush1.msra.mxu1 %v2901_v18 }
 0x2f1   :  { %543 = vmatprep.subr.mxu1 %v2907_v19 }
 0x2f2   :  { %544 = vmatpush1.msra.mxu1 %v2916_v21 }
 0x2f3   :  { %545 = vmatprep.subr.mxu1 %v2922_v22 }
 0x2f4   :  { %546 = vmatpush1.msra.mxu1 %v2951_v28 }
 0x2f5   :  { %547 = vmatprep.subr.mxu1 %v2963_v30 }
 0x2f6   :  { %548 = vmatpush1.msra.mxu1 %v2995_v36 }
 0x2f7   :  { %716 = vmatprep.subr.mxu1 %v3127_v56 }
 0x3a7   :  { %v474_v38 = vpop.f32.mrf.mxu1 }
 0x3a9   :  { %v476_v41 = vpop.f32.mrf.mxu1 }
 0x3aa   :  { %v479_v50 = vsel %vm221_vm1, %v474_v38, %v476_v41 }
 0x3ab   :  { %v480_v52 = vadd.f32 %v479_v50, %v375_v44 }
 0x3ad   :  { %v481_v53 = vadd.f32 %v480_v52, %v3198_v49 }
 0x3af   :  { %v2523_v14 = vmul.f32 -1.442695, %v481_v53 }
 0x3b1   :  { %2621 = vpow2.f32 %v2523_v14 }
 0x3b2   :  { %2623 = vtanh.f32 %v481_v53 }
 0x3be   :  { %v2622_v17 = vpop.eup %2621 }
 0x3bf   :  { %v486_v20 = vadd.f32 1.0, %v2622_v17  ;;  %v2624_v2 = vpop.eup %2623 }
 0x3c1   :  { %2625 = vrcp.f32 %v486_v20 }
 0x3ce   :  { %v2626_v0 = vpop.eup %2625 }
 0x3cf   :  { %v489_v26 = vsel %vm3113_vm4, %v2624_v2, %v2626_v0 }
 0x3d0   :  { %492 = vrot.lane.b32.xlu0 %v489_v26, %s2783_s4  ;;  %v490_v38 = vmul.f32 0.0, %v489_v26 }
 0x442   :  { %v493_v31 = vpop.permute.xlu0 %492 }
 0x443   :  { %v495_v3 = vmul.f32 %v493_v31, %v489_v26 }
 0x445   :  { %497 = vrot.lane.b32.xlu1 %v495_v3, %s2784_s19  ;;  %v3951_v3 = vmov 0.0  }
 0x4b7   :  { %v498_v41 = vpop.permute.xlu1 %497 }
 0x4b8   :  { %v3207_v44 = vadd.f32 %v498_v41, %v490_v38 }
 0x4ba   :  { %2627 = vtanh.f32 %v3207_v44 }
 0x4c7   :  { %v2628_v50 = vpop.eup %2627 }
 0x4c8   :  { %503 = vrot.lane.b32.xlu0 %v2628_v50, %s2783_s4 }
 0x53a   :  { %v504_v52 = vpop.permute.xlu0 %503 }
 0x53b   :  { %v506_v53 = vmul.f32 %v504_v52, %v489_v26 }
 0x53d   :  { %509 = vrot.lane.b32.xlu1 %v506_v53, %s2783_s4 }
 0x5af   :  { %v510_v2 = vpop.permute.xlu1 %509 }
 0x5b0   :  { %v512_v0 = vsel %vm405_vm5, %v404_v23, %v510_v2 }
 0x5b1   :  { %513 = vst.msk [vmem:[%s3943_s6] sm:$0xff] %vm80_vm0, %v512_v0  ;;  %2524 = vmatmul.mubr.msk.f32.vlgmr.msra.gmra.mxu1 %vm80_vm0, %v512_v0  ;;  %2525 = vmatmul.mubr.msk.f32.vlgmr.msra.gmra.mxu0 %vm80_vm0, %v512_v0 }
 0x5b2   :  { %717 = vmatpush1.msra.mxu1 %v3132_v58  ;;  %756 = vmatprep.mubr.f32.mxu1 %v3951_v3 }
 0x5b3   :  { %718 = vmatprep.subr.mxu1 %v3137_v60  ;;  %819 = vmatpush1.msra.mxu0 %v2842_v6 }
 0x5b4   :  { %719 = vmatpush1.msra.mxu1 %v3143_v63  ;;  %820 = vmatprep.subr.mxu0 %v2851_v8 }
 0x5b5   :  { %720 = vmatprep.subr.mxu1 %v3149_v1  ;;  %821 = vmatpush1.msra.mxu0 %v2857_v9 }
 0x5b6   :  { %721 = vmatpush1.msra.mxu1 %v3155_v4  ;;  %822 = vmatprep.subr.mxu0 %v2866_v11 }
 0x5b7   :  { %722 = vmatprep.subr.mxu1 %v3161_v7  ;;  %823 = vmatpush1.msra.mxu0 %v2872_v12 }
 0x5b8   :  { %723 = vmatpush1.msra.mxu1 %v3167_v10  ;;  %824 = vmatprep.subr.mxu0 %v2877_v13 }
 0x5b9   :  { %889 = vmatprep.subr.mxu1 %v2930_v24  ;;  %825 = vmatpush1.msra.mxu0 %v2886_v15 }
 0x5ba   :  { %826 = vmatprep.subr.mxu0 %v2892_v16  ;;  %866 = vmatprep.mubr.f32.mxu0 %v3951_v3 }
 0x5bb   :  { %827 = vmatpush1.msra.mxu0 %v2901_v18 }
 0x5bc   :  { %828 = vmatprep.subr.mxu0 %v2907_v19 }
 0x5bd   :  { %829 = vmatpush1.msra.mxu0 %v2916_v21 }
 0x5be   :  { %830 = vmatprep.subr.mxu0 %v2922_v22 }
 0x5bf   :  { %831 = vmatpush1.msra.mxu0 %v2951_v28 }
 0x5c0   :  { %832 = vmatprep.subr.mxu0 %v2963_v30 }
 0x5c1   :  { %833 = vmatpush1.msra.mxu0 %v2995_v36 }
 0x5c2   :  { %1001 = vmatprep.subr.mxu0 %v3127_v56 }
 0x671   :  { %v583_v23 = vpop.f32.mrf.mxu1  ;;  %v654_v14 = vpop.f32.mrf.mxu0 }
 0x672   :  { %v659_v17 = vsel %vm221_vm1, %v583_v23, %v654_v14 }
 0x673   :  { %v661_v20 = vadd.f32 %v659_v17, %v3094_v51 }
 0x675   :  { %v2526_v26 = vmul.f32 -1.442695, %v661_v20 }
 0x677   :  { %2629 = vpow2.f32 %v2526_v26 }
 0x678   :  { %2631 = vtanh.f32 %v661_v20 }
 0x684   :  { %v2630_v31 = vpop.eup %2629 }
 0x685   :  { %v666_v38 = vadd.f32 1.0, %v2630_v31  ;;  %v2632_v41 = vpop.eup %2631  ;;  %v656_v31 = vpop.f32.mrf.mxu0 }
 0x687   :  { %2633 = vrcp.f32 %v666_v38 }
 0x694   :  { %v2634_v50 = vpop.eup %2633 }
 0x695   :  { %v669_v52 = vsel %vm3113_vm4, %v2632_v41, %v2634_v50 }
 0x696   :  { %672 = vrot.lane.b32.xlu0 %v669_v52, %s2783_s4  ;;  %v670_v0 = vmul.f32 %v669_v52, %v3121_v55  ;;  %v585_v55 = vpop.f32.mrf.mxu1 }
 0x697   :  { %v660_v50 = vsel %vm221_vm1, %v585_v55, %v656_v31 }
 0x708   :  { %v673_v53 = vpop.permute.xlu0 %672 }
 0x709   :  { %v675_v2 = vmul.f32 %v673_v53, %v669_v52 }
 0x70b   :  { %677 = vrot.lane.b32.xlu1 %v675_v2, %s2784_s19 }
 0x77d   :  { %v678_v51 = vpop.permute.xlu1 %677 }
 0x77e   :  { %v3253_v23 = vadd.f32 %v678_v51, %v670_v0 }
 0x780   :  { %2635 = vtanh.f32 %v3253_v23 }
 0x78d   :  { %v2636_v14 = vpop.eup %2635 }
 0x78e   :  { %683 = vrot.lane.b32.xlu0 %v2636_v14, %s2783_s4 }
 0x800   :  { %v684_v17 = vpop.permute.xlu0 %683 }
 0x801   :  { %v686_v20 = vmul.f32 %v684_v17, %v669_v52 }
 0x803   :  { %688 = vrot.lane.b32.xlu1 %v686_v20, %s2784_s19 }
 0x875   :  { %v689_v26 = vpop.permute.xlu1 %688 }
 0x876   :  { %2527 = vmatmul.mubr.msk.f32.vlgmr.msra.gmra.mxu1 %vm405_vm5, %v689_v26 }
 0x877   :  { %890 = vmatpush1.msra.mxu1 %v2936_v25  ;;  %937 = vmatprep.mubr.f32.mxu1 %v3951_v3 }
 0x878   :  { %891 = vmatprep.subr.mxu1 %v2945_v27 }
 0x879   :  { %892 = vmatpush1.msra.mxu1 %v2958_v29 }
 0x87a   :  { %893 = vmatprep.subr.mxu1 %v2973_v32 }
 0x87b   :  { %894 = vmatpush1.msra.mxu1 %v2979_v33 }
 0x87c   :  { %895 = vmatprep.subr.mxu1 %v2989_v35 }
 0x87d   :  { %896 = vmatpush1.msra.mxu1 %v3002_v37 }
 0x87e   :  { %897 = vmatprep.subr.mxu1 %v3012_v39 }
 0x87f   :  { %898 = vmatpush1.msra.mxu1 %v3018_v40 }
 0x880   :  { %899 = vmatprep.subr.mxu1 %v3028_v42 }
 0x881   :  { %900 = vmatpush1.msra.mxu1 %v3036_v43 }
 0x882   :  { %901 = vmatprep.subr.mxu1 %v3046_v45 }
 0x883   :  { %902 = vmatpush1.msra.mxu1 %v3052_v46 }
 0x884   :  { %903 = vmatprep.subr.mxu1 %v3059_v47 }
 0x885   :  { %904 = vmatpush1.msra.mxu1 %v3066_v48 }
 0x886   :  { %1103 = vmatprep.subr.mxu1 %v2837_v5 }
 0x936   :  { %v758_v38 = vpop.f32.mrf.mxu1 }
 0x938   :  { %v760_v41 = vpop.f32.mrf.mxu1 }
 0x939   :  { %v763_v52 = vsel %vm221_vm1, %v758_v38, %v760_v41 }
 0x93a   :  { %v764_v53 = vadd.f32 %v763_v52, %v660_v50 }
 0x93c   :  { %v765_v2 = vadd.f32 %v764_v53, %v3198_v49 }
 0x93e   :  { %v2528_v0 = vmul.f32 -1.442695, %v765_v2 }
 0x940   :  { %2637 = vpow2.f32 %v2528_v0 }
 0x941   :  { %2639 = vtanh.f32 %v765_v2 }
 0x94d   :  { %v2638_v51 = vpop.eup %2637 }
 0x94e   :  { %v770_v14 = vadd.f32 1.0, %v2638_v51  ;;  %v2640_v17 = vpop.eup %2639 }
 0x950   :  { %2641 = vrcp.f32 %v770_v14 }
 0x95d   :  { %v2642_v20 = vpop.eup %2641 }
 0x95e   :  { %v773_v59 = vsel %vm3113_vm4, %v2640_v17, %v2642_v20 }
 0x95f   :  { %776 = vrot.lane.b32.xlu0 %v773_v59, %s2783_s4  ;;  %v774_v38 = vmul.f32 %v773_v59, %v3207_v44 }
 0x9d1   :  { %v777_v55 = vpop.permute.xlu0 %776 }
 0x9d2   :  { %v779_v31 = vmul.f32 %v777_v55, %v773_v59 }
 0x9d4   :  { %781 = vrot.lane.b32.xlu1 %v779_v31, %s2784_s19 }
 0xa46   :  { %v782_v41 = vpop.permute.xlu1 %781 }
 0xa47   :  { %v3286_v50 = vadd.f32 %v782_v41, %v774_v38 }
 0xa49   :  { %2643 = vtanh.f32 %v3286_v50 }
 0xa56   :  { %v2644_v52 = vpop.eup %2643 }
 0xa57   :  { %787 = vrot.lane.b32.xlu0 %v2644_v52, %s2783_s4 }
 0xac9   :  { %v788_v53 = vpop.permute.xlu0 %787 }
 0xaca   :  { %v790_v2 = vmul.f32 %v788_v53, %v773_v59 }
 0xacc   :  { %793 = vrot.lane.b32.xlu1 %v790_v2, %s2783_s4 }
 0xb3e   :  { %v794_v0 = vpop.permute.xlu1 %793 }
 0xb3f   :  { %v796_v51 = vsel %vm405_vm5, %v689_v26, %v794_v0 }
 0xb40   :  { %2529 = vst.msk [vmem:[%s3943_s6 + $0x8] sm:$0xff] %vm80_vm0, %v796_v51  ;;  %2530 = vmatmul.mubr.msk.f32.vlgmr.msra.gmra.mxu0 %vm80_vm0, %v796_v51  ;;  %2531 = vmatmul.mubr.msk.f32.vlgmr.msra.gmra.mxu1 %vm80_vm0, %v796_v51 }
 0xb41   :  { %1002 = vmatpush1.msra.mxu0 %v3132_v58  ;;  %1041 = vmatprep.mubr.f32.mxu0 %v3951_v3 }
 0xb42   :  { %1003 = vmatprep.subr.mxu0 %v3137_v60  ;;  %1104 = vmatpush1.msra.mxu1 %v2842_v6 }
 0xb43   :  { %1004 = vmatpush1.msra.mxu0 %v3143_v63  ;;  %1105 = vmatprep.subr.mxu1 %v2851_v8 }
 0xb44   :  { %1005 = vmatprep.subr.mxu0 %v3149_v1  ;;  %1106 = vmatpush1.msra.mxu1 %v2857_v9 }
 0xb45   :  { %1006 = vmatpush1.msra.mxu0 %v3155_v4  ;;  %1107 = vmatprep.subr.mxu1 %v2866_v11 }
 0xb46   :  { %1007 = vmatprep.subr.mxu0 %v3161_v7  ;;  %1108 = vmatpush1.msra.mxu1 %v2872_v12 }
 0xb47   :  { %1008 = vmatpush1.msra.mxu0 %v3167_v10  ;;  %1109 = vmatprep.subr.mxu1 %v2877_v13 }
 0xb48   :  { %1174 = vmatprep.subr.mxu0 %v2930_v24  ;;  %1110 = vmatpush1.msra.mxu1 %v2886_v15 }
 0xb49   :  { %1111 = vmatprep.subr.mxu1 %v2892_v16  ;;  %1151 = vmatprep.mubr.f32.mxu1 %v3951_v3 }
 0xb4a   :  { %1112 = vmatpush1.msra.mxu1 %v2901_v18 }
 0xb4b   :  { %1113 = vmatprep.subr.mxu1 %v2907_v19 }
 0xb4c   :  { %1114 = vmatpush1.msra.mxu1 %v2916_v21 }
 0xb4d   :  { %1115 = vmatprep.subr.mxu1 %v2922_v22 }
 0xb4e   :  { %1116 = vmatpush1.msra.mxu1 %v2951_v28 }
 0xb4f   :  { %1117 = vmatprep.subr.mxu1 %v2963_v30 }
 0xb50   :  { %1118 = vmatpush1.msra.mxu1 %v2995_v36 }
 0xb51   :  { %1286 = vmatprep.subr.mxu1 %v3127_v56 }
 0xc00   :  { %v868_v59 = vpop.f32.mrf.mxu0  ;;  %v939_v44 = vpop.f32.mrf.mxu1 }
 0xc01   :  { %v944_v26 = vsel %vm221_vm1, %v868_v59, %v939_v44 }
 0xc02   :  { %v946_v14 = vadd.f32 %v944_v26, %v3098_v57 }
 0xc04   :  { %v2532_v17 = vmul.f32 -1.442695, %v946_v14 }
 0xc06   :  { %2645 = vpow2.f32 %v2532_v17 }
 0xc07   :  { %2647 = vtanh.f32 %v946_v14  ;;  %v941_v14 = vpop.f32.mrf.mxu1 }
 0xc13   :  { %v2646_v20 = vpop.eup %2645 }
 0xc14   :  { %v951_v55 = vadd.f32 1.0, %v2646_v20  ;;  %v2648_v31 = vpop.eup %2647 }
 0xc16   :  { %2649 = vrcp.f32 %v951_v55 }
 0xc23   :  { %v2650_v38 = vpop.eup %2649 }
 0xc24   :  { %v954_v41 = vsel %vm3113_vm4, %v2648_v31, %v2650_v38 }
 0xc25   :  { %957 = vrot.lane.b32.xlu0 %v954_v41, %s2783_s4  ;;  %v955_v2 = vmul.f32 %v954_v41, %v3253_v23  ;;  %v870_v23 = vpop.f32.mrf.mxu0 }
 0xc26   :  { %v945_v55 = vsel %vm221_vm1, %v870_v23, %v941_v14 }
 0xc97   :  { %v958_v52 = vpop.permute.xlu0 %957 }
 0xc98   :  { %v960_v53 = vmul.f32 %v958_v52, %v954_v41 }
 0xc9a   :  { %962 = vrot.lane.b32.xlu1 %v960_v53, %s2784_s19 }
 0xd0c   :  { %v963_v57 = vpop.permute.xlu1 %962 }
 0xd0d   :  { %v3332_v0 = vadd.f32 %v963_v57, %v955_v2 }
 0xd0f   :  { %2651 = vtanh.f32 %v3332_v0 }
 0xd1c   :  { %v2652_v51 = vpop.eup %2651 }
 0xd1d   :  { %968 = vrot.lane.b32.xlu0 %v2652_v51, %s2783_s4 }
 0xd8f   :  { %v969_v59 = vpop.permute.xlu0 %968 }
 0xd90   :  { %v971_v44 = vmul.f32 %v969_v59, %v954_v41 }
 0xd92   :  { %973 = vrot.lane.b32.xlu1 %v971_v44, %s2784_s19 }
 0xe04   :  { %v974_v26 = vpop.permute.xlu1 %973 }
 0xe05   :  { %2533 = vmatmul.mubr.msk.f32.vlgmr.msra.gmra.mxu0 %vm405_vm5, %v974_v26 }
 0xe06   :  { %1175 = vmatpush1.msra.mxu0 %v2936_v25  ;;  %1222 = vmatprep.mubr.f32.mxu0 %v3951_v3 }
 0xe07   :  { %1176 = vmatprep.subr.mxu0 %v2945_v27 }
 0xe08   :  { %1177 = vmatpush1.msra.mxu0 %v2958_v29 }
 0xe09   :  { %1178 = vmatprep.subr.mxu0 %v2973_v32 }
 0xe0a   :  { %1179 = vmatpush1.msra.mxu0 %v2979_v33 }
 0xe0b   :  { %1180 = vmatprep.subr.mxu0 %v2989_v35 }
 0xe0c   :  { %1181 = vmatpush1.msra.mxu0 %v3002_v37 }
 0xe0d   :  { %1182 = vmatprep.subr.mxu0 %v3012_v39 }
 0xe0e   :  { %1183 = vmatpush1.msra.mxu0 %v3018_v40 }
 0xe0f   :  { %1184 = vmatprep.subr.mxu0 %v3028_v42 }
 0xe10   :  { %1185 = vmatpush1.msra.mxu0 %v3036_v43 }
 0xe11   :  { %1186 = vmatprep.subr.mxu0 %v3046_v45 }
 0xe12   :  { %1187 = vmatpush1.msra.mxu0 %v3052_v46 }
 0xe13   :  { %1188 = vmatprep.subr.mxu0 %v3059_v47 }
 0xe14   :  { %1189 = vmatpush1.msra.mxu0 %v3066_v48 }
 0xe15   :  { %1388 = vmatprep.subr.mxu0 %v2837_v5 }
 0xec5   :  { %v1043_v17 = vpop.f32.mrf.mxu0 }
 0xec7   :  { %v1045_v20 = vpop.f32.mrf.mxu0 }
 0xec8   :  { %v1048_v31 = vsel %vm221_vm1, %v1043_v17, %v1045_v20 }
 0xec9   :  { %v1049_v38 = vadd.f32 %v1048_v31, %v945_v55 }
 0xecb   :  { %v1050_v41 = vadd.f32 %v1049_v38, %v3198_v49 }
 0xecd   :  { %v2534_v52 = vmul.f32 -1.442695, %v1050_v41 }
 0xecf   :  { %2653 = vpow2.f32 %v2534_v52 }
 0xed0   :  { %2655 = vtanh.f32 %v1050_v41 }
 0xedc   :  { %v2654_v53 = vpop.eup %2653 }
 0xedd   :  { %v1055_v2 = vadd.f32 1.0, %v2654_v53  ;;  %v2656_v5 = vpop.eup %2655 }
 0xedf   :  { %2657 = vrcp.f32 %v1055_v2 }
 0xeec   :  { %v2658_v57 = vpop.eup %2657 }
 0xeed   :  { %v1058_v51 = vsel %vm3113_vm4, %v2656_v5, %v2658_v57 }
 0xeee   :  { %1061 = vrot.lane.b32.xlu0 %v1058_v51, %s2783_s4  ;;  %v1059_v23 = vmul.f32 %v1058_v51, %v3286_v50 }
 0xf60   :  { %v1062_v59 = vpop.permute.xlu0 %1061 }
 0xf61   :  { %v1064_v44 = vmul.f32 %v1062_v59, %v1058_v51 }
 0xf63   :  { %1066 = vrot.lane.b32.xlu1 %v1064_v44, %s2784_s19 }
 0xfd5   :  { %v1067_v14 = vpop.permute.xlu1 %1066 }
 0xfd6   :  { %v3365_v17 = vadd.f32 %v1067_v14, %v1059_v23  ;;  %v3467_v14 = vld [vmem:[%s3939_s2 + $0xe0] sm:$0xff] }
 0xfd8   :  { %2659 = vtanh.f32 %v3365_v17 }
 0xfe5   :  { %v2660_v20 = vpop.eup %2659 }
 0xfe6   :  { %1072 = vrot.lane.b32.xlu0 %v2660_v20, %s2783_s4  ;;  %v3481_v20 = vld [vmem:[%s3939_s2 + $0xc0] sm:$0xff] }
0x1058   :  { %v1073_v55 = vpop.permute.xlu0 %1072 }
0x1059   :  { %v1075_v31 = vmul.f32 %v1073_v55, %v1058_v51  ;;  %v3488_v55 = vld [vmem:[%s3939_s2 + $0xa8] sm:$0xff] }
0x105b   :  { %1078 = vrot.lane.b32.xlu1 %v1075_v31, %s2783_s4  ;;  %v3495_v31 = vld [vmem:[%s3939_s2 + $0xa0] sm:$0xff] }
0x10cd   :  { %v1079_v38 = vpop.permute.xlu1 %1078 }
0x10ce   :  { %v1081_v41 = vsel %vm405_vm5, %v974_v26, %v1079_v38  ;;  %v3502_v38 = vld [vmem:[%s3939_s2 + $0x88] sm:$0xff] }
0x10cf   :  { %2535 = vst.msk [vmem:[%s3943_s6 + $0x10] sm:$0xff] %vm80_vm0, %v1081_v41  ;;  %2536 = vmatmul.mubr.msk.f32.vlgmr.msra.gmra.mxu1 %vm80_vm0, %v1081_v41  ;;  %2537 = vmatmul.mubr.msk.f32.vlgmr.msra.gmra.mxu0 %vm80_vm0, %v1081_v41  ;;  %v3508_v41 = vld [vmem:[%s3939_s2 + $0xf8] sm:$0xff] }
0x10d0   :  { %1287 = vmatpush1.msra.mxu1 %v3132_v58  ;;  %1326 = vmatprep.mubr.f32.mxu1 %v3951_v3 }
0x10d1   :  { %1288 = vmatprep.subr.mxu1 %v3137_v60  ;;  %1389 = vmatpush1.msra.mxu0 %v2842_v6 }
0x10d2   :  { %1289 = vmatpush1.msra.mxu1 %v3143_v63  ;;  %1390 = vmatprep.subr.mxu0 %v2851_v8 }
0x10d3   :  { %1290 = vmatprep.subr.mxu1 %v3149_v1  ;;  %1391 = vmatpush1.msra.mxu0 %v2857_v9 }
0x10d4   :  { %1291 = vmatpush1.msra.mxu1 %v3155_v4  ;;  %1392 = vmatprep.subr.mxu0 %v2866_v11 }
0x10d5   :  { %1292 = vmatprep.subr.mxu1 %v3161_v7  ;;  %1393 = vmatpush1.msra.mxu0 %v2872_v12 }
0x10d6   :  { %1293 = vmatpush1.msra.mxu1 %v3167_v10  ;;  %1394 = vmatprep.subr.mxu0 %v2877_v13 }
0x10d7   :  { %1459 = vmatprep.subr.mxu1 %v2930_v24  ;;  %1395 = vmatpush1.msra.mxu0 %v2886_v15 }
0x10d8   :  { %1396 = vmatprep.subr.mxu0 %v2892_v16  ;;  %1436 = vmatprep.mubr.f32.mxu0 %v3951_v3 }
0x10d9   :  { %1397 = vmatpush1.msra.mxu0 %v2901_v18 }
0x10da   :  { %1398 = vmatprep.subr.mxu0 %v2907_v19 }
0x10db   :  { %1399 = vmatpush1.msra.mxu0 %v2916_v21 }
0x10dc   :  { %1400 = vmatprep.subr.mxu0 %v2922_v22 }
0x10dd   :  { %1401 = vmatpush1.msra.mxu0 %v2951_v28 }
0x10de   :  { %1402 = vmatprep.subr.mxu0 %v2963_v30 }
0x10df   :  { %1403 = vmatpush1.msra.mxu0 %v2995_v36 }
0x10e0   :  { %1571 = vmatprep.subr.mxu0 %v3127_v56 }
0x118f   :  { %v1153_v6 = vpop.f32.mrf.mxu1  ;;  %v1224_v8 = vpop.f32.mrf.mxu0 }
0x1190   :  { %v1229_v9 = vsel %vm221_vm1, %v1153_v6, %v1224_v8  ;;  %v3514_v6 = vld [vmem:[%s3939_s2 + $0x80] sm:$0xff]  ;;  %v3520_v8 = vld [vmem:[%s3939_s2 + $0x68] sm:$0xff] }
0x1191   :  { %v1231_v11 = vadd.f32 %v1229_v9, %v3096_v54  ;;  %v3527_v9 = vld [vmem:[%s3939_s2 + $0x60] sm:$0xff] }
0x1193   :  { %v2538_v12 = vmul.f32 -1.442695, %v1231_v11 }
0x1195   :  { %2661 = vpow2.f32 %v2538_v12  ;;  %v3539_v12 = vld [vmem:[%s3939_s2 + $0x40] sm:$0xff] }
0x1196   :  { %2663 = vtanh.f32 %v1231_v11  ;;  %v3533_v11 = vld [vmem:[%s3939_s2 + $0x48] sm:$0xff] }
0x11a2   :  { %v2662_v13 = vpop.eup %2661 }
0x11a3   :  { %v1236_v15 = vadd.f32 1.0, %v2662_v13  ;;  %v2664_v16 = vpop.eup %2663  ;;  %v3545_v13 = vld [vmem:[%s3939_s2 + $0x28] sm:$0xff] }
0x11a5   :  { %2665 = vrcp.f32 %v1236_v15  ;;  %v3551_v15 = vld [vmem:[%s3939_s2 + $0x20] sm:$0xff] }
0x11b2   :  { %v2666_v18 = vpop.eup %2665 }
0x11b3   :  { %v1239_v19 = vsel %vm3113_vm4, %v2664_v16, %v2666_v18  ;;  %v3557_v16 = vld [vmem:[%s3939_s2 + $0x8] sm:$0xff]  ;;  %v3563_v18 = vld [vmem:[%s3939_s2] sm:$0xff] }
0x11b4   :  { %1242 = vrot.lane.b32.xlu0 %v1239_v19, %s2783_s4  ;;  %v1240_v24 = vmul.f32 %v1239_v19, %v3332_v0 }
0x1226   :  { %v1243_v21 = vpop.permute.xlu0 %1242 }
0x1227   :  { %v1245_v22 = vmul.f32 %v1243_v21, %v1239_v19 }
0x1229   :  { %1247 = vrot.lane.b32.xlu1 %v1245_v22, %s2784_s19 }
0x129b   :  { %v1248_v28 = vpop.permute.xlu1 %1247 }
0x129c   :  { %v3411_v30 = vadd.f32 %v1248_v28, %v1240_v24 }
0x129e   :  { %2667 = vtanh.f32 %v3411_v30 }
0x12ab   :  { %v2668_v36 = vpop.eup %2667 }
0x12ac   :  { %1253 = vrot.lane.b32.xlu0 %v2668_v36, %s2783_s4 }
0x131e   :  { %v1254_v54 = vpop.permute.xlu0 %1253 }
0x131f   :  { %v1256_v50 = vmul.f32 %v1254_v54, %v1239_v19 }
0x1321   :  { %1258 = vrot.lane.b32.xlu1 %v1256_v50, %s2784_s19 }
0x1393   :  { %v1259_v26 = vpop.permute.xlu1 %1258 }
0x1394   :  { %2539 = vmatmul.mubr.msk.f32.vlgmr.msra.gmra.mxu1 %vm405_vm5, %v1259_v26 }
0x1395   :  { %1460 = vmatpush1.msra.mxu1 %v2936_v25  ;;  %1507 = vmatprep.mubr.f32.mxu1 %v3951_v3  ;;  %v3436_v25 = vld [vmem:[%s3939_s2 + $0xe8] sm:$0xff] }
0x1396   :  { %1461 = vmatprep.subr.mxu1 %v2945_v27  ;;  %v1155_v27 = vpop.f32.mrf.mxu1 }
0x1397   :  { %1462 = vmatpush1.msra.mxu1 %v2958_v29  ;;  %v1226_v29 = vpop.f32.mrf.mxu0 }
0x1398   :  { %1463 = vmatprep.subr.mxu1 %v2973_v32 }
0x1399   :  { %1464 = vmatpush1.msra.mxu1 %v2979_v33 }
0x139a   :  { %1465 = vmatprep.subr.mxu1 %v2989_v35  ;;  %v1230_v35 = vsel %vm221_vm1, %v1155_v27, %v1226_v29 }
0x139b   :  { %1466 = vmatpush1.msra.mxu1 %v3002_v37 }
0x139c   :  { %1467 = vmatprep.subr.mxu1 %v3012_v39 }
0x139d   :  { %1468 = vmatpush1.msra.mxu1 %v3018_v40 }
0x139e   :  { %1469 = vmatprep.subr.mxu1 %v3028_v42 }
0x139f   :  { %1470 = vmatpush1.msra.mxu1 %v3036_v43 }
0x13a0   :  { %1471 = vmatprep.subr.mxu1 %v3046_v45 }
0x13a1   :  { %1472 = vmatpush1.msra.mxu1 %v3052_v46 }
0x13a2   :  { %1473 = vmatprep.subr.mxu1 %v3059_v47 }
0x13a3   :  { %1474 = vmatpush1.msra.mxu1 %v3066_v48 }
0x13a4   :  { %1673 = vmatprep.subr.mxu1 %v3436_v25 }
0x1454   :  { %v1328_v32 = vpop.f32.mrf.mxu1 }
0x1456   :  { %v1330_v33 = vpop.f32.mrf.mxu1 }
0x1457   :  { %v1333_v37 = vsel %vm221_vm1, %v1328_v32, %v1330_v33 }
0x1458   :  { %v1334_v39 = vadd.f32 %v1333_v37, %v1230_v35 }
0x145a   :  { %v1335_v40 = vadd.f32 %v1334_v39, %v3198_v49 }
0x145c   :  { %v2540_v42 = vmul.f32 -1.442695, %v1335_v40 }
0x145e   :  { %2669 = vpow2.f32 %v2540_v42  ;;  %v3594_v42 = vld [vmem:[%s3939_s2 + $0xd8] sm:$0xff] }
0x145f   :  { %2671 = vtanh.f32 %v1335_v40 }
0x146b   :  { %v2670_v43 = vpop.eup %2669 }
0x146c   :  { %v1340_v45 = vadd.f32 1.0, %v2670_v43  ;;  %v2672_v46 = vpop.eup %2671  ;;  %v3600_v43 = vld [vmem:[%s3939_s2 + $0xd0] sm:$0xff] }
0x146e   :  { %2673 = vrcp.f32 %v1340_v45  ;;  %v3606_v45 = vld [vmem:[%s3939_s2 + $0xb8] sm:$0xff] }
0x147b   :  { %v2674_v47 = vpop.eup %2673 }
0x147c   :  { %v1343_v48 = vsel %vm3113_vm4, %v2672_v46, %v2674_v47  ;;  %v3612_v46 = vld [vmem:[%s3939_s2 + $0xb0] sm:$0xff]  ;;  %v3618_v47 = vld [vmem:[%s3939_s2 + $0x98] sm:$0xff] }
0x147d   :  { %1346 = vrot.lane.b32.xlu0 %v1343_v48, %s2783_s4  ;;  %v1344_v53 = vmul.f32 %v1343_v48, %v3365_v17  ;;  %v3474_v17 = vld [vmem:[%s3939_s2 + $0xc8] sm:$0xff] }
0x14ef   :  { %v1347_v0 = vpop.permute.xlu0 %1346 }
0x14f0   :  { %v1349_v52 = vmul.f32 %v1347_v0, %v1343_v48  ;;  %v3630_v0 = vld [vmem:[%s3939_s2 + $0x78] sm:$0xff] }
0x14f2   :  { %1351 = vrot.lane.b32.xlu1 %v1349_v52, %s2784_s19  ;;  %v3636_v52 = vld [vmem:[%s3939_s2 + $0x70] sm:$0xff] }
0x1564   :  { %v1352_v2 = vpop.permute.xlu1 %1351 }
0x1565   :  { %v3449_v5 = vadd.f32 %v1352_v2, %v1344_v53  ;;  %v3642_v53 = vld [vmem:[%s3939_s2 + $0x58] sm:$0xff]  ;;  %v3648_v2 = vld [vmem:[%s3939_s2 + $0x50] sm:$0xff] }
0x1567   :  { %2675 = vtanh.f32 %v3449_v5 }
0x1574   :  { %v2676_v57 = vpop.eup %2675 }
0x1575   :  { %1357 = vrot.lane.b32.xlu0 %v2676_v57, %s2783_s4  ;;  %v3654_v57 = vld [vmem:[%s3939_s2 + $0x38] sm:$0xff] }
0x15e7   :  { %v1358_v51 = vpop.permute.xlu0 %1357 }
0x15e8   :  { %v1360_v59 = vmul.f32 %v1358_v51, %v1343_v48  ;;  %v3624_v48 = vld [vmem:[%s3939_s2 + $0x90] sm:$0xff] }
0x15e9   :  { %v3660_v51 = vld [vmem:[%s3939_s2 + $0x30] sm:$0xff] }
0x15ea   :  { %1363 = vrot.lane.b32.xlu1 %v1360_v59, %s2783_s4  ;;  %v3666_v59 = vld [vmem:[%s3939_s2 + $0x18] sm:$0xff] }
0x165c   :  { %v1364_v44 = vpop.permute.xlu1 %1363 }
0x165d   :  { %v1366_v23 = vsel %vm405_vm5, %v1259_v26, %v1364_v44  ;;  %v3672_v44 = vld [vmem:[%s3939_s2 + $0x10] sm:$0xff] }
0x165e   :  { %2541 = vst.msk [vmem:[%s3943_s6 + $0x18] sm:$0xff] %vm80_vm0, %v1366_v23  ;;  %2542 = vmatmul.mubr.msk.f32.vlgmr.msra.gmra.mxu0 %vm80_vm0, %v1366_v23  ;;  %2543 = vmatmul.mubr.msk.f32.vlgmr.msra.gmra.mxu1 %vm80_vm0, %v1366_v23 }
0x165f   :  { %1572 = vmatpush1.msra.mxu0 %v3132_v58  ;;  %1611 = vmatprep.mubr.f32.mxu0 %v3951_v3 }
0x1660   :  { %1573 = vmatprep.subr.mxu0 %v3137_v60  ;;  %1674 = vmatpush1.msra.mxu1 %v3467_v14 }
0x1661   :  { %1574 = vmatpush1.msra.mxu0 %v3143_v63  ;;  %1675 = vmatprep.subr.mxu1 %v3474_v17 }
0x1662   :  { %1575 = vmatprep.subr.mxu0 %v3149_v1  ;;  %1676 = vmatpush1.msra.mxu1 %v3481_v20 }
0x1663   :  { %1576 = vmatpush1.msra.mxu0 %v3155_v4  ;;  %1677 = vmatprep.subr.mxu1 %v3488_v55 }
0x1664   :  { %1577 = vmatprep.subr.mxu0 %v3161_v7  ;;  %1678 = vmatpush1.msra.mxu1 %v3495_v31 }
0x1665   :  { %1578 = vmatpush1.msra.mxu0 %v3167_v10  ;;  %1679 = vmatprep.subr.mxu1 %v3502_v38 }
0x1666   :  { %1744 = vmatprep.subr.mxu0 %v3508_v41  ;;  %1680 = vmatpush1.msra.mxu1 %v3514_v6 }
0x1667   :  { %1681 = vmatprep.subr.mxu1 %v3520_v8  ;;  %1721 = vmatprep.mubr.f32.mxu1 %v3951_v3 }
0x1668   :  { %1682 = vmatpush1.msra.mxu1 %v3527_v9 }
0x1669   :  { %1683 = vmatprep.subr.mxu1 %v3533_v11 }
0x166a   :  { %1684 = vmatpush1.msra.mxu1 %v3539_v12 }
0x166b   :  { %1685 = vmatprep.subr.mxu1 %v3545_v13 }
0x166c   :  { %1686 = vmatpush1.msra.mxu1 %v3551_v15 }
0x166d   :  { %1687 = vmatprep.subr.mxu1 %v3557_v16 }
0x166e   :  { %1688 = vmatpush1.msra.mxu1 %v3563_v18 }
0x166f   :  { %1856 = vmatprep.subr.mxu1 %v3127_v56 }
0x171e   :  { %v1438_v19 = vpop.f32.mrf.mxu0  ;;  %v1509_v21 = vpop.f32.mrf.mxu1 }
0x171f   :  { %v1514_v22 = vsel %vm221_vm1, %v1438_v19, %v1509_v21 }
0x1720   :  { %v1516_v24 = vadd.f32 %v1514_v22, %v3104_v62  ;;  %v1440_v23 = vpop.f32.mrf.mxu0  ;;  %v1511_v19 = vpop.f32.mrf.mxu1 }
0x1722   :  { %v2544_v28 = vmul.f32 -1.442695, %v1516_v24 }
0x1724   :  { %2677 = vpow2.f32 %v2544_v28 }
0x1725   :  { %2679 = vtanh.f32 %v1516_v24  ;;  %v1515_v24 = vsel %vm221_vm1, %v1440_v23, %v1511_v19 }
0x1731   :  { %v2678_v36 = vpop.eup %2677 }
0x1732   :  { %v1521_v54 = vadd.f32 1.0, %v2678_v36  ;;  %v2680_v50 = vpop.eup %2679 }
0x1734   :  { %2681 = vrcp.f32 %v1521_v54 }
0x1741   :  { %v2682_v26 = vpop.eup %2681 }
0x1742   :  { %v1524_v27 = vsel %vm3113_vm4, %v2680_v50, %v2682_v26 }
0x1743   :  { %1527 = vrot.lane.b32.xlu0 %v1524_v27, %s2783_s4  ;;  %v1525_v32 = vmul.f32 %v1524_v27, %v3411_v30  ;;  %v3587_v30 = vld [vmem:[%s3939_s2 + $0xf0] sm:$0xff] }
0x17b5   :  { %v1528_v56 = vpop.permute.xlu0 %1527 }
0x17b6   :  { %v1530_v29 = vmul.f32 %v1528_v56, %v1524_v27 }
0x17b8   :  { %1532 = vrot.lane.b32.xlu1 %v1530_v29, %s2784_s19 }
0x182a   :  { %v1533_v62 = vpop.permute.xlu1 %1532 }
0x182b   :  { %v3575_v33 = vadd.f32 %v1533_v62, %v1525_v32 }
0x182d   :  { %2683 = vtanh.f32 %v3575_v33 }
0x183a   :  { %v2684_v35 = vpop.eup %2683 }
0x183b   :  { %1538 = vrot.lane.b32.xlu0 %v2684_v35, %s2783_s4 }
0x18ad   :  { %v1539_v37 = vpop.permute.xlu0 %1538 }
0x18ae   :  { %v1541_v39 = vmul.f32 %v1539_v37, %v1524_v27 }
0x18b0   :  { %1543 = vrot.lane.b32.xlu1 %v1541_v39, %s2784_s19 }
0x1922   :  { %v3580_v40 = vpop.permute.xlu1 %1543 }
0x1923   :  { %2545 = vmatmul.mubr.msk.f32.vlgmr.msra.gmra.mxu0 %vm405_vm5, %v3580_v40 }
0x1924   :  { %1745 = vmatpush1.msra.mxu0 %v3587_v30  ;;  %1792 = vmatprep.mubr.f32.mxu0 %v3951_v3 }
0x1925   :  { %1746 = vmatprep.subr.mxu0 %v3594_v42 }
0x1926   :  { %1747 = vmatpush1.msra.mxu0 %v3600_v43 }
0x1927   :  { %1748 = vmatprep.subr.mxu0 %v3606_v45 }
0x1928   :  { %1749 = vmatpush1.msra.mxu0 %v3612_v46 }
0x1929   :  { %1750 = vmatprep.subr.mxu0 %v3618_v47 }
0x192a   :  { %1751 = vmatpush1.msra.mxu0 %v3624_v48 }
0x192b   :  { %1752 = vmatprep.subr.mxu0 %v3630_v0 }
0x192c   :  { %1753 = vmatpush1.msra.mxu0 %v3636_v52 }
0x192d   :  { %1754 = vmatprep.subr.mxu0 %v3642_v53 }
0x192e   :  { %1755 = vmatpush1.msra.mxu0 %v3648_v2 }
0x192f   :  { %1756 = vmatprep.subr.mxu0 %v3654_v57 }
0x1930   :  { %1757 = vmatpush1.msra.mxu0 %v3660_v51 }
0x1931   :  { %1758 = vmatprep.subr.mxu0 %v3666_v59 }
0x1932   :  { %1759 = vmatpush1.msra.mxu0 %v3672_v44 }
0x1933   :  { %1958 = vmatprep.subr.mxu0 %v3436_v25 }
0x19e3   :  { %v1613_v21 = vpop.f32.mrf.mxu0 }
0x19e5   :  { %v1615_v22 = vpop.f32.mrf.mxu0 }
0x19e6   :  { %v1618_v28 = vsel %vm221_vm1, %v1613_v21, %v1615_v22 }
0x19e7   :  { %v1619_v36 = vadd.f32 %v1618_v28, %v1515_v24 }
0x19e9   :  { %v1620_v54 = vadd.f32 %v1619_v36, %v3198_v49 }
0x19eb   :  { %v2546_v50 = vmul.f32 -1.442695, %v1620_v54 }
0x19ed   :  { %2685 = vpow2.f32 %v2546_v50 }
0x19ee   :  { %2687 = vtanh.f32 %v1620_v54 }
0x19fa   :  { %v2686_v26 = vpop.eup %2685 }
0x19fb   :  { %v1625_v27 = vadd.f32 1.0, %v2686_v26  ;;  %v2688_v56 = vpop.eup %2687 }
0x19fd   :  { %2689 = vrcp.f32 %v1625_v27 }
0x1a0a   :  { %v2690_v29 = vpop.eup %2689 }
0x1a0b   :  { %v1628_v32 = vsel %vm3113_vm4, %v2688_v56, %v2690_v29 }
0x1a0c   :  { %1631 = vrot.lane.b32.xlu0 %v1628_v32, %s2783_s4  ;;  %v1629_v37 = vmul.f32 %v1628_v32, %v3449_v5 }
0x1a7e   :  { %v1632_v62 = vpop.permute.xlu0 %1631 }
0x1a7f   :  { %v1634_v35 = vmul.f32 %v1632_v62, %v1628_v32 }
0x1a81   :  { %1636 = vrot.lane.b32.xlu1 %v1634_v35, %s2784_s19 }
0x1af3   :  { %v1637_v49 = vpop.permute.xlu1 %1636 }
0x1af4   :  { %v3686_v39 = vadd.f32 %v1637_v49, %v1629_v37 }
0x1af6   :  { %2691 = vtanh.f32 %v3686_v39 }
0x1b03   :  { %v2692_v23 = vpop.eup %2691 }
0x1b04   :  { %1642 = vrot.lane.b32.xlu0 %v2692_v23, %s2783_s4 }
0x1b76   :  { %v1643_v19 = vpop.permute.xlu0 %1642 }
0x1b77   :  { %v1645_v21 = vmul.f32 %v1643_v19, %v1628_v32 }
0x1b79   :  { %1648 = vrot.lane.b32.xlu1 %v1645_v21, %s2783_s4 }
0x1beb   :  { %v1649_v22 = vpop.permute.xlu1 %1648 }
0x1bec   :  { %v1651_v24 = vsel %vm405_vm5, %v3580_v40, %v1649_v22 }
0x1bed   :  { %2547 = vst.msk [vmem:[%s3943_s6 + $0x20] sm:$0xff] %vm80_vm0, %v1651_v24  ;;  %2548 = vmatmul.mubr.msk.f32.vlgmr.msra.gmra.mxu1 %vm80_vm0, %v1651_v24  ;;  %2549 = vmatmul.mubr.msk.f32.vlgmr.msra.gmra.mxu0 %vm80_vm0, %v1651_v24 }
0x1bee   :  { %1857 = vmatpush1.msra.mxu1 %v3132_v58  ;;  %1896 = vmatprep.mubr.f32.mxu1 %v3951_v3  ;;  %v3727_v58 = vld [vmem:[%s3941_s3 + $0x38] sm:$0xff] }
0x1bef   :  { %1858 = vmatprep.subr.mxu1 %v3137_v60  ;;  %1959 = vmatpush1.msra.mxu0 %v3467_v14 }
0x1bf0   :  { %1859 = vmatpush1.msra.mxu1 %v3143_v63  ;;  %1960 = vmatprep.subr.mxu0 %v3474_v17 }
0x1bf1   :  { %1860 = vmatprep.subr.mxu1 %v3149_v1  ;;  %1961 = vmatpush1.msra.mxu0 %v3481_v20 }
0x1bf2   :  { %1861 = vmatpush1.msra.mxu1 %v3155_v4  ;;  %1962 = vmatprep.subr.mxu0 %v3488_v55  ;;  %v3952_v4 = vld [vmem:[#allocation2_spill] sm:$0xff] }
0x1bf3   :  { %1862 = vmatprep.subr.mxu1 %v3161_v7  ;;  %1963 = vmatpush1.msra.mxu0 %v3495_v31 }
0x1bf4   :  { %1863 = vmatpush1.msra.mxu1 %v3167_v10  ;;  %1964 = vmatprep.subr.mxu0 %v3502_v38 }
0x1bf5   :  { %2029 = vmatprep.subr.mxu1 %v3508_v41  ;;  %1965 = vmatpush1.msra.mxu0 %v3514_v6 }
0x1bf6   :  { %1966 = vmatprep.subr.mxu0 %v3520_v8  ;;  %2006 = vmatprep.mubr.f32.mxu0 %v3951_v3 }
0x1bf7   :  { %1967 = vmatpush1.msra.mxu0 %v3527_v9 }
0x1bf8   :  { %1968 = vmatprep.subr.mxu0 %v3533_v11 }
0x1bf9   :  { %1969 = vmatpush1.msra.mxu0 %v3539_v12 }
0x1bfa   :  { %1970 = vmatprep.subr.mxu0 %v3545_v13 }
0x1bfb   :  { %1971 = vmatpush1.msra.mxu0 %v3551_v15 }
0x1bfc   :  { %1972 = vmatprep.subr.mxu0 %v3557_v16 }
0x1bfd   :  { %1973 = vmatpush1.msra.mxu0 %v3563_v18 }
0x1bfe   :  { %2141 = vmatprep.subr.mxu0 %v3727_v58 }
0x1cad   :  { %v1723_v60 = vpop.f32.mrf.mxu1  ;;  %v1794_v63 = vpop.f32.mrf.mxu0 }
0x1cae   :  { %v1799_v1 = vsel %vm221_vm1, %v1723_v60, %v1794_v63  ;;  %v3768_v60 = vld [vmem:[%s3942_s5] sm:$0xff] }
0x1caf   :  { %v1801_v7 = vadd.f32 %v1799_v1, %v3952_v4  ;;  %v1796_v49 = vpop.f32.mrf.mxu0 }
0x1cb1   :  { %v2550_v10 = vmul.f32 -1.442695, %v1801_v7 }
0x1cb3   :  { %2693 = vpow2.f32 %v2550_v10 }
0x1cb4   :  { %2695 = vtanh.f32 %v1801_v7 }
0x1cc0   :  { %v2694_v5 = vpop.eup %2693 }
0x1cc1   :  { %v1806_v40 = vadd.f32 1.0, %v2694_v5  ;;  %v2696_v28 = vpop.eup %2695 }
0x1cc3   :  { %2697 = vrcp.f32 %v1806_v40 }
0x1cd0   :  { %v2698_v36 = vpop.eup %2697 }
0x1cd1   :  { %v1809_v54 = vsel %vm3113_vm4, %v2696_v28, %v2698_v36 }
0x1cd2   :  { %1812 = vrot.lane.b32.xlu0 %v1809_v54, %s2783_s4  ;;  %v1810_v27 = vmul.f32 %v1809_v54, %v3575_v33  ;;  %v1725_v33 = vpop.f32.mrf.mxu1 }
0x1cd3   :  { %v1800_v21 = vsel %vm221_vm1, %v1725_v33, %v1796_v49  ;;  %v3812_v33 = vld [vmem:[%s3941_s3 + $0x18] sm:$0xff] }
0x1d44   :  { %v1813_v50 = vpop.permute.xlu0 %1812 }
0x1d45   :  { %v1815_v26 = vmul.f32 %v1813_v50, %v1809_v54 }
0x1d47   :  { %1817 = vrot.lane.b32.xlu1 %v1815_v26, %s2784_s19 }
0x1db9   :  { %v1818_v56 = vpop.permute.xlu1 %1817 }
0x1dba   :  { %v3738_v29 = vadd.f32 %v1818_v56, %v1810_v27 }
0x1dbc   :  { %2699 = vtanh.f32 %v3738_v29 }
0x1dc9   :  { %v2700_v32 = vpop.eup %2699 }
0x1dca   :  { %1823 = vrot.lane.b32.xlu0 %v2700_v32, %s2783_s4 }
0x1e3c   :  { %v1824_v62 = vpop.permute.xlu0 %1823 }
0x1e3d   :  { %v1826_v35 = vmul.f32 %v1824_v62, %v1809_v54 }
0x1e3f   :  { %1828 = vrot.lane.b32.xlu1 %v1826_v35, %s2784_s19  ;;  %v3798_v35 = vld [vmem:[%s3941_s3 + $0x28] sm:$0xff] }
0x1eb1   :  { %v1829_v37 = vpop.permute.xlu1 %1828 }
0x1eb2   :  { %2551 = vmatmul.mubr.msk.f32.vlgmr.msra.gmra.mxu1 %vm405_vm5, %v1829_v37 }
0x1eb3   :  { %2030 = vmatpush1.msra.mxu1 %v3587_v30  ;;  %2077 = vmatprep.mubr.f32.mxu1 %v3951_v3 }
0x1eb4   :  { %2031 = vmatprep.subr.mxu1 %v3594_v42 }
0x1eb5   :  { %2032 = vmatpush1.msra.mxu1 %v3600_v43 }
0x1eb6   :  { %2033 = vmatprep.subr.mxu1 %v3606_v45 }
0x1eb7   :  { %2034 = vmatpush1.msra.mxu1 %v3612_v46 }
0x1eb8   :  { %2035 = vmatprep.subr.mxu1 %v3618_v47 }
0x1eb9   :  { %2036 = vmatpush1.msra.mxu1 %v3624_v48 }
0x1eba   :  { %2037 = vmatprep.subr.mxu1 %v3630_v0 }
0x1ebb   :  { %2038 = vmatpush1.msra.mxu1 %v3636_v52 }
0x1ebc   :  { %2039 = vmatprep.subr.mxu1 %v3642_v53 }
0x1ebd   :  { %2040 = vmatpush1.msra.mxu1 %v3648_v2 }
0x1ebe   :  { %2041 = vmatprep.subr.mxu1 %v3654_v57 }
0x1ebf   :  { %2042 = vmatpush1.msra.mxu1 %v3660_v51 }
0x1ec0   :  { %2043 = vmatprep.subr.mxu1 %v3666_v59 }
0x1ec1   :  { %2044 = vmatpush1.msra.mxu1 %v3672_v44 }
0x1ec2   :  { %2243 = vmatprep.subr.mxu1 %v3436_v25 }
0x1f72   :  { %v1898_v23 = vpop.f32.mrf.mxu1 }
0x1f74   :  { %v1900_v19 = vpop.f32.mrf.mxu1 }
0x1f75   :  { %v1903_v22 = vsel %vm221_vm1, %v1898_v23, %v1900_v19 }
0x1f76   :  { %v1904_v24 = vadd.f32 %v1903_v22, %v1800_v21 }
0x1f78   :  { %v1905_v63 = vadd.f32 %v3768_v60, %v1904_v24 }
0x1f7a   :  { %v2552_v1 = vmul.f32 -1.442695, %v1905_v63 }
0x1f7c   :  { %2701 = vpow2.f32 %v2552_v1 }
0x1f7d   :  { %2703 = vtanh.f32 %v1905_v63 }
0x1f89   :  { %v2702_v25 = vpop.eup %2701 }
0x1f8a   :  { %v1910_v4 = vadd.f32 1.0, %v2702_v25  ;;  %v2704_v7 = vpop.eup %2703 }
0x1f8c   :  { %2705 = vrcp.f32 %v1910_v4 }
0x1f99   :  { %v2706_v10 = vpop.eup %2705 }
0x1f9a   :  { %v1913_v5 = vsel %vm3113_vm4, %v2704_v7, %v2706_v10 }
0x1f9b   :  { %1916 = vrot.lane.b32.xlu0 %v1913_v5, %s2783_s4  ;;  %v1914_v36 = vmul.f32 %v1913_v5, %v3686_v39  ;;  %v3791_v39 = vld [vmem:[%s3941_s3 + $0x30] sm:$0xff] }
0x200d   :  { %v1917_v40 = vpop.permute.xlu0 %1916 }
0x200e   :  { %v1919_v28 = vmul.f32 %v1917_v40, %v1913_v5 }
0x2010   :  { %1921 = vrot.lane.b32.xlu1 %v1919_v28, %s2784_s19 }
0x2082   :  { %v1922_v54 = vpop.permute.xlu1 %1921 }
0x2083   :  { %v3776_v50 = vadd.f32 %v1922_v54, %v1914_v36 }
0x2085   :  { %2707 = vtanh.f32 %v3776_v50 }
0x2092   :  { %v2708_v26 = vpop.eup %2707 }
0x2093   :  { %1927 = vrot.lane.b32.xlu0 %v2708_v26, %s2783_s4 }
0x2105   :  { %v1928_v27 = vpop.permute.xlu0 %1927 }
0x2106   :  { %v1930_v56 = vmul.f32 %v1928_v27, %v1913_v5 }
0x2108   :  { %1933 = vrot.lane.b32.xlu1 %v1930_v56, %s2783_s4 }
0x217a   :  { %v1934_v32 = vpop.permute.xlu1 %1933 }
0x217b   :  { %v1936_v62 = vsel %vm405_vm5, %v1829_v37, %v1934_v32  ;;  %v3805_v37 = vld [vmem:[%s3941_s3 + $0x20] sm:$0xff] }
0x217c   :  { %2553 = vst.msk [vmem:[%s3943_s6 + $0x28] sm:$0xff] %vm80_vm0, %v1936_v62  ;;  %2554 = vmatmul.mubr.msk.f32.vlgmr.msra.gmra.mxu0 %vm80_vm0, %v1936_v62  ;;  %2555 = vmatmul.mubr.msk.f32.vlgmr.msra.gmra.mxu1 %vm80_vm0, %v1936_v62 }
0x217d   :  { %2142 = vmatpush1.msra.mxu0 %v3791_v39  ;;  %2181 = vmatprep.mubr.f32.mxu0 %v3951_v3 }
0x217e   :  { %2143 = vmatprep.subr.mxu0 %v3798_v35  ;;  %2244 = vmatpush1.msra.mxu1 %v3467_v14  ;;  %v3819_v14 = vld [vmem:[%s3941_s3 + $0x10] sm:$0xff] }
0x217f   :  { %2144 = vmatpush1.msra.mxu0 %v3805_v37  ;;  %2245 = vmatprep.subr.mxu1 %v3474_v17  ;;  %v3826_v17 = vld [vmem:[%s3941_s3 + $0x8] sm:$0xff] }
0x2180   :  { %2145 = vmatprep.subr.mxu0 %v3812_v33  ;;  %2246 = vmatpush1.msra.mxu1 %v3481_v20  ;;  %v3833_v20 = vld [vmem:[%s3941_s3] sm:$0xff] }
0x2181   :  { %2146 = vmatpush1.msra.mxu0 %v3819_v14  ;;  %2247 = vmatprep.subr.mxu1 %v3488_v55 }
0x2182   :  { %2147 = vmatprep.subr.mxu0 %v3826_v17  ;;  %2248 = vmatpush1.msra.mxu1 %v3495_v31 }
0x2183   :  { %2148 = vmatpush1.msra.mxu0 %v3833_v20  ;;  %2249 = vmatprep.subr.mxu1 %v3502_v38 }
0x2184   :  { %2314 = vmatprep.subr.mxu0 %v3508_v41  ;;  %2250 = vmatpush1.msra.mxu1 %v3514_v6  ;;  %v3953_v41 = vld [vmem:[#allocation4_spill] sm:$0xff] }
0x2185   :  { %2251 = vmatprep.subr.mxu1 %v3520_v8  ;;  %2291 = vmatprep.mubr.f32.mxu1 %v3951_v3 }
0x2186   :  { %2252 = vmatpush1.msra.mxu1 %v3527_v9 }
0x2187   :  { %2253 = vmatprep.subr.mxu1 %v3533_v11 }
0x2188   :  { %2254 = vmatpush1.msra.mxu1 %v3539_v12 }
0x2189   :  { %2255 = vmatprep.subr.mxu1 %v3545_v13 }
0x218a   :  { %2256 = vmatpush1.msra.mxu1 %v3551_v15 }
0x218b   :  { %2257 = vmatprep.subr.mxu1 %v3557_v16 }
0x218c   :  { %2258 = vmatpush1.msra.mxu1 %v3563_v18 }
0x218d   :  { %2426 = vmatprep.subr.mxu1 %v3727_v58 }
0x223c   :  { %v2008_v55 = vpop.f32.mrf.mxu0  ;;  %v2079_v31 = vpop.f32.mrf.mxu1 }
0x223d   :  { %v2084_v38 = vsel %vm221_vm1, %v2008_v55, %v2079_v31 }
0x223e   :  { %v2086_v6 = vadd.f32 %v2084_v38, %v3953_v41 }
0x2240   :  { %v2556_v8 = vmul.f32 -1.442695, %v2086_v6 }
0x2242   :  { %2709 = vpow2.f32 %v2556_v8 }
0x2243   :  { %2711 = vtanh.f32 %v2086_v6 }
0x224f   :  { %v2710_v9 = vpop.eup %2709 }
0x2250   :  { %v2091_v11 = vadd.f32 1.0, %v2710_v9  ;;  %v2712_v12 = vpop.eup %2711 }
0x2252   :  { %2713 = vrcp.f32 %v2091_v11 }
0x225f   :  { %v2714_v13 = vpop.eup %2713 }
0x2260   :  { %v2094_v15 = vsel %vm3113_vm4, %v2712_v12, %v2714_v13 }
0x2261   :  { %2097 = vrot.lane.b32.xlu0 %v2094_v15, %s2783_s4  ;;  %v2095_v58 = vmul.f32 %v2094_v15, %v3738_v29 }
0x22d3   :  { %v2098_v16 = vpop.permute.xlu0 %2097 }
0x22d4   :  { %v2100_v18 = vmul.f32 %v2098_v16, %v2094_v15 }
0x22d6   :  { %2102 = vrot.lane.b32.xlu1 %v2100_v18, %s2784_s19 }
0x2348   :  { %v2103_v49 = vpop.permute.xlu1 %2102 }
0x2349   :  { %v3857_v23 = vadd.f32 %v2103_v49, %v2095_v58 }
0x234b   :  { %2715 = vtanh.f32 %v3857_v23 }
0x2358   :  { %v2716_v19 = vpop.eup %2715 }
0x2359   :  { %2108 = vrot.lane.b32.xlu0 %v2716_v19, %s2783_s4 }
0x23cb   :  { %v2109_v21 = vpop.permute.xlu0 %2108 }
0x23cc   :  { %v2111_v22 = vmul.f32 %v2109_v21, %v2094_v15 }
0x23ce   :  { %2113 = vrot.lane.b32.xlu1 %v2111_v22, %s2784_s19 }
0x2440   :  { %v2114_v24 = vpop.permute.xlu1 %2113 }
0x2441   :  { %2557 = vmatmul.mubr.msk.f32.vlgmr.msra.gmra.mxu0 %vm405_vm5, %v2114_v24 }
0x2442   :  { %2315 = vmatpush1.msra.mxu0 %v3587_v30  ;;  %2362 = vmatprep.mubr.f32.mxu0 %v3951_v3  ;;  %v2010_v30 = vpop.f32.mrf.mxu0 }
0x2443   :  { %2316 = vmatprep.subr.mxu0 %v3594_v42  ;;  %v2081_v42 = vpop.f32.mrf.mxu1 }
0x2444   :  { %2317 = vmatpush1.msra.mxu0 %v3600_v43 }
0x2445   :  { %2318 = vmatprep.subr.mxu0 %v3606_v45 }
0x2446   :  { %2319 = vmatpush1.msra.mxu0 %v3612_v46  ;;  %v2085_v46 = vsel %vm221_vm1, %v2010_v30, %v2081_v42 }
0x2447   :  { %2320 = vmatprep.subr.mxu0 %v3618_v47 }
0x2448   :  { %2321 = vmatpush1.msra.mxu0 %v3624_v48 }
0x2449   :  { %2322 = vmatprep.subr.mxu0 %v3630_v0 }
0x244a   :  { %2323 = vmatpush1.msra.mxu0 %v3636_v52 }
0x244b   :  { %2324 = vmatprep.subr.mxu0 %v3642_v53 }
0x244c   :  { %2325 = vmatpush1.msra.mxu0 %v3648_v2 }
0x244d   :  { %2326 = vmatprep.subr.mxu0 %v3654_v57 }
0x244e   :  { %2327 = vmatpush1.msra.mxu0 %v3660_v51 }
0x244f   :  { %2328 = vmatprep.subr.mxu0 %v3666_v59 }
0x2450   :  { %2329 = vmatpush1.msra.mxu0 %v3672_v44 }
0x2501   :  { %v2183_v43 = vpop.f32.mrf.mxu0 }
0x2503   :  { %v2185_v45 = vpop.f32.mrf.mxu0 }
0x2504   :  { %v2188_v47 = vsel %vm221_vm1, %v2183_v43, %v2185_v45 }
0x2505   :  { %v2189_v48 = vadd.f32 %v2188_v47, %v2085_v46 }
0x2507   :  { %v2190_v0 = vadd.f32 %v3768_v60, %v2189_v48 }
0x2509   :  { %v2558_v52 = vmul.f32 -1.442695, %v2190_v0 }
0x250b   :  { %2717 = vpow2.f32 %v2558_v52 }
0x250c   :  { %2719 = vtanh.f32 %v2190_v0 }
0x2518   :  { %v2718_v53 = vpop.eup %2717 }
0x2519   :  { %v2195_v2 = vadd.f32 1.0, %v2718_v53  ;;  %v2720_v57 = vpop.eup %2719 }
0x251b   :  { %2721 = vrcp.f32 %v2195_v2 }
0x2528   :  { %v2722_v51 = vpop.eup %2721 }
0x2529   :  { %v2198_v59 = vsel %vm3113_vm4, %v2720_v57, %v2722_v51 }
0x252a   :  { %2201 = vrot.lane.b32.xlu0 %v2198_v59, %s2783_s4  ;;  %v2199_v63 = vmul.f32 %v2198_v59, %v3776_v50  ;;  %v3954_v50 = vld [vmem:[#allocation3_spill] sm:$0xff] }
0x259c   :  { %v2202_v44 = vpop.permute.xlu0 %2201 }
0x259d   :  { %v2204_v29 = vmul.f32 %v2202_v44, %v2198_v59 }
0x259f   :  { %2206 = vrot.lane.b32.xlu1 %v2204_v29, %s2784_s19 }
0x2611   :  { %v2207_v1 = vpop.permute.xlu1 %2206 }
0x2612   :  { %v3889_v25 = vadd.f32 %v2207_v1, %v2199_v63 }
0x2614   :  { %2723 = vtanh.f32 %v3889_v25 }
0x2621   :  { %v2724_v4 = vpop.eup %2723 }
0x2622   :  { %2212 = vrot.lane.b32.xlu0 %v2724_v4, %s2783_s4 }
0x2694   :  { %v2213_v7 = vpop.permute.xlu0 %2212 }
0x2695   :  { %v2215_v10 = vmul.f32 %v2213_v7, %v2198_v59 }
0x2697   :  { %2218 = vrot.lane.b32.xlu1 %v2215_v10, %s2783_s4 }
0x2709   :  { %v2219_v5 = vpop.permute.xlu1 %2218 }
0x270a   :  { %v2221_v40 = vsel %vm405_vm5, %v2114_v24, %v2219_v5 }
0x270b   :  { %2559 = vst.msk [vmem:[%s3943_s6 + $0x30] sm:$0xff] %vm80_vm0, %v2221_v40  ;;  %2560 = vmatmul.mubr.msk.f32.vlgmr.msra.gmra.mxu1 %vm80_vm0, %v2221_v40  ;;  %2561 = vmatmul.mubr.msk.f32.vlgmr.msra.gmra.mxu0 %vm80_vm0, %v2221_v40 }
0x270c   :  { %2427 = vmatpush1.msra.mxu1 %v3791_v39  ;;  %2466 = vmatprep.mubr.f32.mxu1 %v3951_v3 }
0x270d   :  { %2428 = vmatprep.subr.mxu1 %v3798_v35 }
0x270e   :  { %2429 = vmatpush1.msra.mxu1 %v3805_v37 }
0x270f   :  { %2430 = vmatprep.subr.mxu1 %v3812_v33 }
0x2710   :  { %2431 = vmatpush1.msra.mxu1 %v3819_v14 }
0x2711   :  { %2432 = vmatprep.subr.mxu1 %v3826_v17 }
0x2712   :  { %2433 = vmatpush1.msra.mxu1 %v3833_v20 }
0x27cb   :  { %v2293_v28 = vpop.f32.mrf.mxu1  ;;  %v2364_v36 = vpop.f32.mrf.mxu0 }
0x27cc   :  { %v2369_v54 = vsel %vm221_vm1, %v2293_v28, %v2364_v36 }
0x27cd   :  { %v2371_v26 = vadd.f32 %v2369_v54, %v3954_v50  ;;  %v2295_v41 = vpop.f32.mrf.mxu1  ;;  %v2366_v6 = vpop.f32.mrf.mxu0 }
0x27ce   :  { %v2370_v11 = vsel %vm221_vm1, %v2295_v41, %v2366_v6 }
0x27cf   :  { %v2562_v3 = vmul.f32 -1.442695, %v2371_v26 }
0x27d1   :  { %2725 = vpow2.f32 %v2562_v3 }
0x27d2   :  { %2727 = vtanh.f32 %v2371_v26 }
0x27de   :  { %v2726_v27 = vpop.eup %2725 }
0x27df   :  { %v2376_v56 = vadd.f32 1.0, %v2726_v27  ;;  %v2728_v32 = vpop.eup %2727 }
0x27e1   :  { %2729 = vrcp.f32 %v2376_v56 }
0x27ee   :  { %v2730_v62 = vpop.eup %2729 }
0x27ef   :  { %v2379_v39 = vsel %vm3113_vm4, %v2728_v32, %v2730_v62 }
0x27f0   :  { %2382 = vrot.lane.b32.xlu0 %v2379_v39, %s2783_s4  ;;  %v2380_v33 = vmul.f32 %v2379_v39, %v3857_v23 }
0x2862   :  { %v2383_v35 = vpop.permute.xlu0 %2382 }
0x2863   :  { %v2385_v37 = vmul.f32 %v2383_v35, %v2379_v39 }
0x2865   :  { %2387 = vrot.lane.b32.xlu1 %v2385_v37, %s2784_s19 }
0x28d7   :  { %v2388_v14 = vpop.permute.xlu1 %2387 }
0x28d8   :  { %v2390_v17 = vadd.f32 %v2388_v14, %v2380_v33 }
0x28da   :  { %2731 = vtanh.f32 %v2390_v17 }
0x28e7   :  { %v2732_v20 = vpop.eup %2731 }
0x28e8   :  { %2393 = vrot.lane.b32.xlu0 %v2732_v20, %s2783_s4 }
0x295a   :  { %v2394_v55 = vpop.permute.xlu0 %2393 }
0x295b   :  { %v2396_v31 = vmul.f32 %v2394_v55, %v2379_v39 }
0x295d   :  { %2398 = vrot.lane.b32.xlu1 %v2396_v31, %s2784_s19 }
0x29cf   :  { %v2399_v38 = vpop.permute.xlu1 %2398 }
0x29d0   :  { %2563 = vmatmul.mubr.msk.f32.vlgmr.msra.gmra.mxu1 %vm405_vm5, %v2399_v38 }
0x2a90   :  { %v2468_v8 = vpop.f32.mrf.mxu1 }
0x2a92   :  { %v2470_v9 = vpop.f32.mrf.mxu1 }
0x2a93   :  { %v2473_v12 = vsel %vm221_vm1, %v2468_v8, %v2470_v9 }
0x2a94   :  { %v2474_v13 = vadd.f32 %v2473_v12, %v2370_v11 }
0x2a96   :  { %v2475_v15 = vadd.f32 %v3768_v60, %v2474_v13 }
0x2a98   :  { %v2564_v16 = vmul.f32 -1.442695, %v2475_v15 }
0x2a9a   :  { %2733 = vpow2.f32 %v2564_v16 }
0x2a9b   :  { %2735 = vtanh.f32 %v2475_v15 }
0x2aa7   :  { %v2734_v18 = vpop.eup %2733 }
0x2aa8   :  { %v2480_v58 = vadd.f32 1.0, %v2734_v18  ;;  %v2736_v49 = vpop.eup %2735 }
0x2aaa   :  { %2737 = vrcp.f32 %v2480_v58 }
0x2ab7   :  { %v2738_v23 = vpop.eup %2737 }
0x2ab8   :  { %v2483_v19 = vsel %vm3113_vm4, %v2736_v49, %v2738_v23 }
0x2ab9   :  { %2486 = vrot.lane.b32.xlu0 %v2483_v19, %s2783_s4  ;;  %v2484_v61 = vmul.f32 %v2483_v19, %v3889_v25 }
0x2b2b   :  { %v2487_v21 = vpop.permute.xlu0 %2486 }
0x2b2c   :  { %v2489_v22 = vmul.f32 %v2487_v21, %v2483_v19 }
0x2b2e   :  { %2491 = vrot.lane.b32.xlu1 %v2489_v22, %s2784_s19 }
0x2ba0   :  { %v2492_v60 = vpop.permute.xlu1 %2491 }
0x2ba1   :  { %v2494_v24 = vadd.f32 %v2492_v60, %v2484_v61 }
0x2ba3   :  { %2739 = vtanh.f32 %v2494_v24 }
0x2bb0   :  { %v2740_v30 = vpop.eup %2739 }
0x2bb1   :  { %2497 = vrot.lane.b32.xlu0 %v2740_v30, %s2783_s4 }
0x2c23   :  { %v2498_v42 = vpop.permute.xlu0 %2497 }
0x2c24   :  { %v2500_v43 = vmul.f32 %v2498_v42, %v2483_v19 }
0x2c26   :  { %2503 = vrot.lane.b32.xlu1 %v2500_v43, %s2783_s4 }
0x2c98   :  { %v2504_v34 = vpop.permute.xlu1 %2503 }
0x2c99   :  { %v2506_v45 = vsel %vm405_vm5, %v2399_v38, %v2504_v34 }
0x2c9a   :  { %2565 = vst.msk [vmem:[%s3943_s6 + $0x38] sm:$0xff] %vm80_vm0, %v2506_v45 }

</bundles_post_ra>
